<compile_context>
chip_gen: v6e
topology: v6e:2x2x1
jax: 0.10.0
libtpu: 0.0.40
codegen_flags: <defaults>
</compile_context>

<pallas_src>
import functools

import numpy as np

import jax
import jax.numpy as jnp
from jax.experimental import pallas as pl
from jax.experimental.pallas import tpu as pltpu

OUT_CHANNELS = (8, 16, 32)
KERNELS = (5, 5, 3)
PAD = 1
HIDDEN = 128
LANES = 128                      # TPU lane width; every activation row is 128 lanes.
MXU_DTYPE = jnp.bfloat16         # MXU operand dtype (accumulation stays f32).

_W_NAMES = ("T1", "cb1", "T2", "cb2", "T3", "cb3", "fw1", "fb1", "fw2", "fb2")


def _round_up(x, m):
    return ((x + m - 1) // m) * m


# ----------------------------------------------------------------------------
# Static geometry (mirrors CNNtorchUpdated.calculate_conv_output)
# ----------------------------------------------------------------------------
def layer_geometry(input_channels, img_size):
    """Per-layer sizes for the (padded_row*TB + sample, w*c-interleaved-lane) layout."""
    geoms = []
    c_in, s, stride = input_channels, img_size, input_channels
    for k, c_out in zip(KERNELS, OUT_CHANNELS):
        ho = s - k + 2 * PAD + 1                 # conv output spatial size (square)
        assert ho >= 2, "spatial size collapsed below the 2x2 pool window"
        assert (s - 1) * stride + c_in <= LANES, "input row exceeds 128 lanes"
        assert ho * c_out <= LANES, "conv output row exceeds 128 lanes"
        geoms.append(dict(c_in=c_in, c_out=c_out, k=k, h_in=s, hp=s + 2 * PAD,
                          ho=ho, hpool=ho // 2, pos_stride=stride))
        # Pooled rows keep a non-compacted layout: pooled pixel j of this layer
        # lives at lanes [2*j*c_out, 2*j*c_out + c_out).  The in-between lanes
        # hold finite garbage which the next layer's Toeplitz matrix maps
        # through all-zero rows (invariant relied on in build_effective_params).
        c_in, s, stride = c_out, ho // 2, 2 * c_out
    return geoms, s                              # s = final spatial size (Hf == Wf)


# ----------------------------------------------------------------------------
# Fused Pallas kernel: 3x (conv + ReLU + maxpool) + classifier, TB samples/step
# ----------------------------------------------------------------------------
def _fused_cnn_kernel(x_ref, t1_ref, cb1_ref, t2_ref, cb2_ref, t3_ref, cb3_ref,
                      fw1_ref, fb1_ref, fw2_ref, fb2_ref, out_ref, *, geoms, tb):
    """One grid step = TB samples; the whole network stays resident in VMEM.

    Activation layout is a flat (padded_row*TB + sample, 128) slab, so every
    slice below is a whole (TB, 128) row-block (TB is a multiple of the bf16
    sublane tile => full-vreg operations, no single-sublane slices/stores).
    """
    t_refs = (t1_ref, t2_ref, t3_ref)
    cb_refs = (cb1_ref, cb2_ref, cb3_ref)

    # Vertical zero padding (one row-block top + bottom) is added here, not in
    # the wrapper, so no padded copy of the batch is ever materialized in HBM.
    zpad = jnp.zeros((tb, LANES), MXU_DTYPE)
    xp = jnp.concatenate([zpad, x_ref[0], zpad], axis=0)      # (hp1*TB, 128) bf16

    pooled = None
    for li, g in enumerate(geoms):
        k, ho, hpool = g["k"], g["ho"], g["hpool"]

        # --- conv as ONE fused MXU matmul (bf16 operands, f32 accumulation) ---
        # Lane-block di of the operand holds the padded rows shifted by di
        # (128-aligned pieces), matching the K-concatenated Toeplitz weight.
        band = jnp.concatenate(
            [xp[di * tb:(di + ho) * tb, :] for di in range(k)], axis=1)
        y = jnp.dot(band, t_refs[li][...],
                    preferred_element_type=jnp.float32)        # (ho*TB, 256) f32
        y = jnp.maximum(y + cb_refs[li][...], 0.0)             # bias + ReLU

        # --- fused 2x2 / stride-2 max pool -------------------------------------
        # Lanes [128, 256) hold the conv row shifted left by one pixel (built
        # into the Toeplitz weights), so the horizontal max is lane-aligned.
        yh = jnp.maximum(y[:, :LANES], y[:, LANES:])           # (ho*TB, 128)
        pooled = [jnp.maximum(yh[(2 * j) * tb:(2 * j + 1) * tb, :],
                              yh[(2 * j + 1) * tb:(2 * j + 2) * tb, :])
                  for j in range(hpool)]                       # hpool x (TB, 128)
        # TODO(synk): Dropout2d(p=0.1) is identity in eval mode; training-mode
        # stochastic channel dropout is not implemented.

        if li + 1 < len(geoms):
            zf = jnp.zeros((tb, LANES), jnp.float32)
            xp = jnp.concatenate([zf] + pooled + [zf], axis=0).astype(MXU_DTYPE)

    # --- classifier: Linear(32*s*s, 128) -> Linear(128, num_classes) -----------
    # (PyTorch NCHW flatten order is folded into fw1; fc2 is zero-padded to a
    #  lane-dense 128-wide output at init, so the store below is unmasked.)
    y1 = fb1_ref[...]
    for hi in range(len(pooled)):
        y1 = y1 + jnp.dot(pooled[hi].astype(MXU_DTYPE), fw1_ref[hi],
                          preferred_element_type=jnp.float32)
    y2 = jnp.dot(y1.astype(MXU_DTYPE), fw2_ref[...],
                 preferred_element_type=jnp.float32) + fb2_ref[...]
    out_ref[0] = y2                                            # (TB, 128)


# ----------------------------------------------------------------------------
# One-time (init-time) construction of the effective, kernel-friendly weights
# ----------------------------------------------------------------------------
def build_effective_params(params, input_channels, img_size, num_classes):
    geoms, s_final = layer_geometry(input_channels, img_size)
    assert num_classes <= LANES
    eff = {}

    for li, g in enumerate(geoms):
        k, c_in, c_out = g["k"], g["c_in"], g["c_out"]
        w_in, ho, stride = g["h_in"], g["ho"], g["pos_stride"]
        wconv = np.asarray(params[f"conv{li + 1}_w"], np.float32)  # (co, ci, k, k)
        bias = np.asarray(params[f"conv{li + 1}_b"], np.float32)

        # Block-Toeplitz bands: band di maps one padded input row to one conv
        # output row (lanes [0,128)) plus a one-pixel-left-shifted copy
        # (lanes [128,256)).  Horizontal zero padding and the non-compacted
        # pooled input layout are encoded by which rows are (non-)zero; garbage
        # lanes of the pooled input hit all-zero rows here (invariant).
        T = np.zeros((k, LANES, 2 * LANES), np.float32)
        for di in range(k):
            for wo in range(ho):
                for dj in range(k):
                    w = wo + dj - PAD
                    if 0 <= w < w_in:
                        blk = wconv[:, :, di, dj].T            # (c_in, c_out)
                        r0 = w * stride
                        T[di, r0:r0 + c_in, wo * c_out:(wo + 1) * c_out] = blk
                        if wo >= 1:
                            c0 = LANES + (wo - 1) * c_out
                            T[di, r0:r0 + c_in, c0:c0 + c_out] = blk
        brow = np.zeros((1, 2 * LANES), np.float32)
        for wo in range(ho):
            brow[0, wo * c_out:(wo + 1) * c_out] = bias
            if wo >= 1:
                brow[0, LANES + (wo - 1) * c_out:LANES + wo * c_out] = bias
        # Fuse the k bands along the contraction axis -> single MXU matmul.
        eff[f"T{li + 1}"] = jnp.asarray(T.reshape(k * LANES, 2 * LANES), MXU_DTYPE)
        eff[f"cb{li + 1}"] = jnp.asarray(brow)                  # f32 (added post-MXU)

    # Classifier: fold the NCHW flatten order into the fc1 weight (done once).
    g3 = geoms[-1]
    c3 = g3["c_out"]
    hf = wf = s_final
    w1 = np.asarray(params["fc1_w"], np.float32)                # (HIDDEN, c3*hf*wf)
    assert w1.shape[1] == c3 * hf * wf
    W1 = np.zeros((hf, LANES, HIDDEN), np.float32)
    for hi in range(hf):
        for wi in range(wf):
            for c in range(c3):
                W1[hi, 2 * wi * c3 + c, :] = w1[:, c * hf * wf + hi * wf + wi]
    eff["fw1"] = jnp.asarray(W1, MXU_DTYPE)
    eff["fb1"] = jnp.asarray(np.asarray(params["fc1_b"], np.float32)[None, :])

    # fc2 zero-padded to 128 output lanes -> lane-dense output stores.
    W2 = np.zeros((HIDDEN, LANES), np.float32)
    W2[:, :num_classes] = np.asarray(params["fc2_w"], np.float32).T
    b2 = np.zeros((1, LANES), np.float32)
    b2[0, :num_classes] = np.asarray(params["fc2_b"], np.float32)
    eff["fw2"] = jnp.asarray(W2, MXU_DTYPE)
    eff["fb2"] = jnp.asarray(b2)
    return eff


# ----------------------------------------------------------------------------
# Wrapper: single fused pallas_call over grid=(batch // TB,)
# ----------------------------------------------------------------------------
def make_forward(input_channels, img_size, num_classes, tb=16):
    assert tb % 16 == 0, "TB must be a multiple of the bf16 sublane tile (16)"
    geoms, _ = layer_geometry(input_channels, img_size)
    kernel = functools.partial(_fused_cnn_kernel, geoms=geoms, tb=tb)
    wc = img_size * input_channels

    def _const_spec(a):
        # Constant block index => Pallas DMAs the weight exactly once; the
        # default double-buffer reservation is negligible here, so
        # pipeline_mode=pl.Buffered(1) is left unapplied on purpose.
        return pl.BlockSpec(a.shape, lambda i, _z=(0,) * a.ndim: _z)

    def forward(eff, x_nchw):
        n = x_nchw.shape[0]
        n_pad = _round_up(n, tb)
        if n_pad != n:
            x_nchw = jnp.pad(x_nchw, ((0, n_pad - n), (0, 0), (0, 0), (0, 0)))
        nb = n_pad // tb

        # NCHW -> per-block (row*TB + sample, w*c) slab, lane-padded to 128 and
        # cast to bf16.  One fused XLA relayout of the input; vertical pad rows
        # are added inside the kernel.
        xt = jnp.transpose(x_nchw, (2, 0, 3, 1)).reshape(img_size, n_pad, wc)
        xt = xt.reshape(img_size, nb, tb, wc).transpose(1, 0, 2, 3)
        xt = xt.reshape(nb, img_size * tb, wc)
        xr = jnp.pad(xt, ((0, 0), (0, 0), (0, LANES - wc))).astype(MXU_DTYPE)

        in_specs = [pl.BlockSpec((1, img_size * tb, LANES), lambda i: (i, 0, 0))]
        in_specs += [_const_spec(eff[name]) for name in _W_NAMES]

        out = pl.pallas_call(
            kernel,
            out_shape=jax.ShapeDtypeStruct((nb, tb, LANES), jnp.float32),
            grid_spec=pltpu.PrefetchScalarGridSpec(
                num_scalar_prefetch=0,
                grid=(nb,),
                in_specs=in_specs,
                out_specs=pl.BlockSpec((1, tb, LANES), lambda i: (i, 0, 0)),
                scratch_shapes=[]),
            compiler_params=pltpu.CompilerParams(
                dimension_semantics=("parallel",)),
        )(xr, *[eff[name] for name in _W_NAMES])
        return out.reshape(n_pad, LANES)[:n, :num_classes]

    return forward


# ----------------------------------------------------------------------------
# Pure-JAX references + deterministic parameter init (PyTorch layouts)
# ----------------------------------------------------------------------------
def reference_forward(params, x_nchw, mxu_dtype=None):
    """mxu_dtype=None: full-f32 reference (HIGHEST precision).
    mxu_dtype=jnp.bfloat16: matmul/conv operands cast to bf16 with f32
    accumulation, matching the kernel's MXU numerics bit-for-bit (up to
    accumulation order)."""
    cast = (lambda a: a) if mxu_dtype is None else (lambda a: a.astype(mxu_dtype))
    prec = jax.lax.Precision.HIGHEST if mxu_dtype is None else jax.lax.Precision.DEFAULT
    y = x_nchw
    for li in range(3):
        w = params[f"conv{li + 1}_w"]
        b = params[f"conv{li + 1}_b"]
        y = jax.lax.conv_general_dilated(
            cast(y), cast(w), (1, 1), ((PAD, PAD), (PAD, PAD)),
            dimension_numbers=("NCHW", "OIHW", "NCHW"),
            preferred_element_type=jnp.float32, precision=prec)
        y = jax.nn.relu(y + b[None, :, None, None])
        y = jax.lax.reduce_window(y, -jnp.inf, jax.lax.max,
                                  (1, 1, 2, 2), (1, 1, 2, 2), "VALID")
        # Dropout2d(p=0.1): identity at inference.
    y = y.reshape(y.shape[0], -1)
    y = jnp.dot(cast(y), cast(params["fc1_w"].T),
                preferred_element_type=jnp.float32, precision=prec) + params["fc1_b"]
    y = jnp.dot(cast(y), cast(params["fc2_w"].T),
                preferred_element_type=jnp.float32, precision=prec) + params["fc2_b"]
    return y


def init_params(key, input_channels, img_size, num_classes):
    _, s = layer_geometry(input_channels, img_size)
    ks = jax.random.split(key, 10)
    p = {}
    c_in = input_channels
    for i, (c_out, k) in enumerate(zip(OUT_CHANNELS, KERNELS)):
        p[f"conv{i + 1}_w"] = 0.1 * jax.random.normal(
            ks[2 * i], (c_out, c_in, k, k), jnp.float32)
        p[f"conv{i + 1}_b"] = 0.1 * jax.random.normal(
            ks[2 * i + 1], (c_out,), jnp.float32)
        c_in = c_out
    feat = OUT_CHANNELS[-1] * s * s
    p["fc1_w"] = 0.1 * jax.random.normal(ks[6], (HIDDEN, feat), jnp.float32)
    p["fc1_b"] = 0.1 * jax.random.normal(ks[7], (HIDDEN,), jnp.float32)
    p["fc2_w"] = 0.1 * jax.random.normal(ks[8], (num_classes, HIDDEN), jnp.float32)
    p["fc2_b"] = 0.1 * jax.random.normal(ks[9], (num_classes,), jnp.float32)
    return p


if __name__ == "__main__":
    INPUT_CHANNELS = 4
    IMG_SIZE = 16
    NUM_CLASSES = 10
    TB = 16                   # samples per grid step (multiple of bf16 sublane tile)
    BATCH = 2 * TB            # -> grid of 2 blocks, so both v7x TensorCores get work

    key = jax.random.PRNGKey(0)
    kx, kp = jax.random.split(key)

    x = jax.random.normal(kx, (BATCH, INPUT_CHANNELS, IMG_SIZE, IMG_SIZE), jnp.float32)
    params = init_params(kp, INPUT_CHANNELS, IMG_SIZE, NUM_CLASSES)
    eff = build_effective_params(params, INPUT_CHANNELS, IMG_SIZE, NUM_CLASSES)

    forward = jax.jit(make_forward(INPUT_CHANNELS, IMG_SIZE, NUM_CLASSES, tb=TB))
    out = jax.block_until_ready(forward(eff, x))
    assert out.shape == (BATCH, NUM_CLASSES), out.shape

    # Tight check: reference using the same bf16 MXU operands / f32 accumulation.
    # This validates the Toeplitz folding, fused pooling and classifier exactly.
    ref_matched = reference_forward(params, x, mxu_dtype=MXU_DTYPE)
    err_matched = float(jnp.max(jnp.abs(out - ref_matched)))
    assert err_matched < 1e-2, f"mismatch vs matched-precision reference: {err_matched}"

    # Loose sanity check vs the full-f32 reference; the gap is the expected
    # bf16-operand quantization of a 5-matmul-deep network (not a layout bug).
    ref_f32 = reference_forward(params, x)
    err_f32 = float(jnp.max(jnp.abs(out - ref_f32)))
    assert err_f32 < 0.25, f"bf16-operand drift vs f32 reference too large: {err_f32}"

    print("KERNEL_OK")
</pallas_src>

<mosaic_0001>
module attributes {stable_mosaic.version = 11 : i64} {
  func.func @_fused_cnn_kernel(%arg0: i32, %arg1: memref<1x256x128xbf16, #tpu.memory_space<vmem>>, %arg2: memref<640x256xbf16, #tpu.memory_space<vmem>>, %arg3: memref<1x256xf32, #tpu.memory_space<vmem>>, %arg4: memref<640x256xbf16, #tpu.memory_space<vmem>>, %arg5: memref<1x256xf32, #tpu.memory_space<vmem>>, %arg6: memref<384x256xbf16, #tpu.memory_space<vmem>>, %arg7: memref<1x256xf32, #tpu.memory_space<vmem>>, %arg8: memref<1x128x128xbf16, #tpu.memory_space<vmem>>, %arg9: memref<1x128xf32, #tpu.memory_space<vmem>>, %arg10: memref<128x128xbf16, #tpu.memory_space<vmem>>, %arg11: memref<1x128xf32, #tpu.memory_space<vmem>>, %arg12: memref<1x16x128xf32, #tpu.memory_space<vmem>>) attributes {dimension_semantics = [#tpu.dimension_semantics<parallel>], iteration_bounds = array<i64: 2>, scalar_prefetch = 0 : i64, scratch_operands = 0 : i64, tpu.core_type = #tpu.core_type<tc>, window_params = [{transform_indices = @transform_0, window_bounds = array<i64: 1, 256, 128>}, {pipeline_mode = #tpu.pipeline_mode<synchronous>, transform_indices = @transform_1, window_bounds = array<i64: 640, 256>}, {pipeline_mode = #tpu.pipeline_mode<synchronous>, transform_indices = @transform_2, window_bounds = array<i64: 1, 256>}, {pipeline_mode = #tpu.pipeline_mode<synchronous>, transform_indices = @transform_3, window_bounds = array<i64: 640, 256>}, {pipeline_mode = #tpu.pipeline_mode<synchronous>, transform_indices = @transform_4, window_bounds = array<i64: 1, 256>}, {pipeline_mode = #tpu.pipeline_mode<synchronous>, transform_indices = @transform_5, window_bounds = array<i64: 384, 256>}, {pipeline_mode = #tpu.pipeline_mode<synchronous>, transform_indices = @transform_6, window_bounds = array<i64: 1, 256>}, {pipeline_mode = #tpu.pipeline_mode<synchronous>, transform_indices = @transform_7, window_bounds = array<i64: 1, 128, 128>}, {pipeline_mode = #tpu.pipeline_mode<synchronous>, transform_indices = @transform_8, window_bounds = array<i64: 1, 128>}, {pipeline_mode = #tpu.pipeline_mode<synchronous>, transform_indices = @transform_9, window_bounds = array<i64: 128, 128>}, {pipeline_mode = #tpu.pipeline_mode<synchronous>, transform_indices = @transform_10, window_bounds = array<i64: 1, 128>}, {transform_indices = @transform_11, window_bounds = array<i64: 1, 16, 128>}]} {
    %cst = arith.constant 0.000000e+00 : bf16
    %0 = vector.broadcast %cst : bf16 to vector<16x128xbf16>
    %c0 = arith.constant 0 : index
    %c0_0 = arith.constant 0 : index
    %c0_1 = arith.constant 0 : index
    %1 = vector.load %arg1[%c0, %c0_0, %c0_1] : memref<1x256x128xbf16, #tpu.memory_space<vmem>>, vector<1x256x128xbf16>
    %2 = vector.shape_cast %1 : vector<1x256x128xbf16> to vector<256x128xbf16>
    %3 = tpu.concatenate %0, %2, %0 in 0 : vector<16x128xbf16>, vector<256x128xbf16>, vector<16x128xbf16> -> vector<288x128xbf16>
    %4 = vector.extract_strided_slice %3 {offsets = [0, 0], sizes = [224, 128], strides = [1, 1]} : vector<288x128xbf16> to vector<224x128xbf16>
    %5 = vector.extract_strided_slice %3 {offsets = [16, 0], sizes = [224, 128], strides = [1, 1]} : vector<288x128xbf16> to vector<224x128xbf16>
    %6 = vector.extract_strided_slice %3 {offsets = [32, 0], sizes = [224, 128], strides = [1, 1]} : vector<288x128xbf16> to vector<224x128xbf16>
    %7 = vector.extract_strided_slice %3 {offsets = [48, 0], sizes = [224, 128], strides = [1, 1]} : vector<288x128xbf16> to vector<224x128xbf16>
    %8 = vector.extract_strided_slice %3 {offsets = [64, 0], sizes = [224, 128], strides = [1, 1]} : vector<288x128xbf16> to vector<224x128xbf16>
    %9 = tpu.concatenate %4, %5, %6, %7, %8 in 1 : vector<224x128xbf16>, vector<224x128xbf16>, vector<224x128xbf16>, vector<224x128xbf16>, vector<224x128xbf16> -> vector<224x640xbf16>
    %c0_2 = arith.constant 0 : index
    %c0_3 = arith.constant 0 : index
    %10 = vector.load %arg2[%c0_2, %c0_3] : memref<640x256xbf16, #tpu.memory_space<vmem>>, vector<640x256xbf16>
    %cst_4 = arith.constant dense<0.000000e+00> : vector<224x256xf32>
    %11 = tpu.matmul %9, %10, %cst_4 {dimension_numbers = #tpu.dot_dimension_numbers<[1], [0], [0], [1], [0, 0, 1, 1], [], []>} : vector<224x640xbf16>, vector<640x256xbf16>, vector<224x256xf32> -> vector<224x256xf32>
    %c0_5 = arith.constant 0 : index
    %c0_6 = arith.constant 0 : index
    %12 = vector.load %arg3[%c0_5, %c0_6] : memref<1x256xf32, #tpu.memory_space<vmem>>, vector<1x256xf32>
    %13 = vector.broadcast %12 : vector<1x256xf32> to vector<224x256xf32>
    %14 = arith.addf %11, %13 : vector<224x256xf32>
    %cst_7 = arith.constant 0.000000e+00 : f32
    %15 = vector.broadcast %cst_7 : f32 to vector<224x256xf32>
    %16 = arith.maximumf %14, %15 : vector<224x256xf32>
    %17 = vector.extract_strided_slice %16 {offsets = [0, 0], sizes = [224, 128], strides = [1, 1]} : vector<224x256xf32> to vector<224x128xf32>
    %18 = vector.extract_strided_slice %16 {offsets = [0, 128], sizes = [224, 128], strides = [1, 1]} : vector<224x256xf32> to vector<224x128xf32>
    %19 = arith.maximumf %17, %18 : vector<224x128xf32>
    %20 = vector.extract_strided_slice %19 {offsets = [0, 0], sizes = [16, 128], strides = [1, 1]} : vector<224x128xf32> to vector<16x128xf32>
    %21 = vector.extract_strided_slice %19 {offsets = [16, 0], sizes = [16, 128], strides = [1, 1]} : vector<224x128xf32> to vector<16x128xf32>
    %22 = arith.maximumf %20, %21 : vector<16x128xf32>
    %23 = vector.extract_strided_slice %19 {offsets = [32, 0], sizes = [16, 128], strides = [1, 1]} : vector<224x128xf32> to vector<16x128xf32>
    %24 = vector.extract_strided_slice %19 {offsets = [48, 0], sizes = [16, 128], strides = [1, 1]} : vector<224x128xf32> to vector<16x128xf32>
    %25 = arith.maximumf %23, %24 : vector<16x128xf32>
    %26 = vector.extract_strided_slice %19 {offsets = [64, 0], sizes = [16, 128], strides = [1, 1]} : vector<224x128xf32> to vector<16x128xf32>
    %27 = vector.extract_strided_slice %19 {offsets = [80, 0], sizes = [16, 128], strides = [1, 1]} : vector<224x128xf32> to vector<16x128xf32>
    %28 = arith.maximumf %26, %27 : vector<16x128xf32>
    %29 = vector.extract_strided_slice %19 {offsets = [96, 0], sizes = [16, 128], strides = [1, 1]} : vector<224x128xf32> to vector<16x128xf32>
    %30 = vector.extract_strided_slice %19 {offsets = [112, 0], sizes = [16, 128], strides = [1, 1]} : vector<224x128xf32> to vector<16x128xf32>
    %31 = arith.maximumf %29, %30 : vector<16x128xf32>
    %32 = vector.extract_strided_slice %19 {offsets = [128, 0], sizes = [16, 128], strides = [1, 1]} : vector<224x128xf32> to vector<16x128xf32>
    %33 = vector.extract_strided_slice %19 {offsets = [144, 0], sizes = [16, 128], strides = [1, 1]} : vector<224x128xf32> to vector<16x128xf32>
    %34 = arith.maximumf %32, %33 : vector<16x128xf32>
    %35 = vector.extract_strided_slice %19 {offsets = [160, 0], sizes = [16, 128], strides = [1, 1]} : vector<224x128xf32> to vector<16x128xf32>
    %36 = vector.extract_strided_slice %19 {offsets = [176, 0], sizes = [16, 128], strides = [1, 1]} : vector<224x128xf32> to vector<16x128xf32>
    %37 = arith.maximumf %35, %36 : vector<16x128xf32>
    %38 = vector.extract_strided_slice %19 {offsets = [192, 0], sizes = [16, 128], strides = [1, 1]} : vector<224x128xf32> to vector<16x128xf32>
    %39 = vector.extract_strided_slice %19 {offsets = [208, 0], sizes = [16, 128], strides = [1, 1]} : vector<224x128xf32> to vector<16x128xf32>
    %40 = arith.maximumf %38, %39 : vector<16x128xf32>
    %cst_8 = arith.constant 0.000000e+00 : f32
    %41 = vector.broadcast %cst_8 : f32 to vector<16x128xf32>
    %42 = tpu.concatenate %41, %22, %25, %28, %31, %34, %37, %40, %41 in 0 : vector<16x128xf32>, vector<16x128xf32>, vector<16x128xf32>, vector<16x128xf32>, vector<16x128xf32>, vector<16x128xf32>, vector<16x128xf32>, vector<16x128xf32>, vector<16x128xf32> -> vector<144x128xf32>
    %43 = arith.truncf %42 : vector<144x128xf32> to vector<144x128xbf16>
    %44 = vector.extract_strided_slice %43 {offsets = [0, 0], sizes = [80, 128], strides = [1, 1]} : vector<144x128xbf16> to vector<80x128xbf16>
    %45 = vector.extract_strided_slice %43 {offsets = [16, 0], sizes = [80, 128], strides = [1, 1]} : vector<144x128xbf16> to vector<80x128xbf16>
    %46 = vector.extract_strided_slice %43 {offsets = [32, 0], sizes = [80, 128], strides = [1, 1]} : vector<144x128xbf16> to vector<80x128xbf16>
    %47 = vector.extract_strided_slice %43 {offsets = [48, 0], sizes = [80, 128], strides = [1, 1]} : vector<144x128xbf16> to vector<80x128xbf16>
    %48 = vector.extract_strided_slice %43 {offsets = [64, 0], sizes = [80, 128], strides = [1, 1]} : vector<144x128xbf16> to vector<80x128xbf16>
    %49 = tpu.concatenate %44, %45, %46, %47, %48 in 1 : vector<80x128xbf16>, vector<80x128xbf16>, vector<80x128xbf16>, vector<80x128xbf16>, vector<80x128xbf16> -> vector<80x640xbf16>
    %c0_9 = arith.constant 0 : index
    %c0_10 = arith.constant 0 : index
    %50 = vector.load %arg4[%c0_9, %c0_10] : memref<640x256xbf16, #tpu.memory_space<vmem>>, vector<640x256xbf16>
    %cst_11 = arith.constant dense<0.000000e+00> : vector<80x256xf32>
    %51 = tpu.matmul %49, %50, %cst_11 {dimension_numbers = #tpu.dot_dimension_numbers<[1], [0], [0], [1], [0, 0, 1, 1], [], []>} : vector<80x640xbf16>, vector<640x256xbf16>, vector<80x256xf32> -> vector<80x256xf32>
    %c0_12 = arith.constant 0 : index
    %c0_13 = arith.constant 0 : index
    %52 = vector.load %arg5[%c0_12, %c0_13] : memref<1x256xf32, #tpu.memory_space<vmem>>, vector<1x256xf32>
    %53 = vector.broadcast %52 : vector<1x256xf32> to vector<80x256xf32>
    %54 = arith.addf %51, %53 : vector<80x256xf32>
    %cst_14 = arith.constant 0.000000e+00 : f32
    %55 = vector.broadcast %cst_14 : f32 to vector<80x256xf32>
    %56 = arith.maximumf %54, %55 : vector<80x256xf32>
    %57 = vector.extract_strided_slice %56 {offsets = [0, 0], sizes = [80, 128], strides = [1, 1]} : vector<80x256xf32> to vector<80x128xf32>
    %58 = vector.extract_strided_slice %56 {offsets = [0, 128], sizes = [80, 128], strides = [1, 1]} : vector<80x256xf32> to vector<80x128xf32>
    %59 = arith.maximumf %57, %58 : vector<80x128xf32>
    %60 = vector.extract_strided_slice %59 {offsets = [0, 0], sizes = [16, 128], strides = [1, 1]} : vector<80x128xf32> to vector<16x128xf32>
    %61 = vector.extract_strided_slice %59 {offsets = [16, 0], sizes = [16, 128], strides = [1, 1]} : vector<80x128xf32> to vector<16x128xf32>
    %62 = arith.maximumf %60, %61 : vector<16x128xf32>
    %63 = vector.extract_strided_slice %59 {offsets = [32, 0], sizes = [16, 128], strides = [1, 1]} : vector<80x128xf32> to vector<16x128xf32>
    %64 = vector.extract_strided_slice %59 {offsets = [48, 0], sizes = [16, 128], strides = [1, 1]} : vector<80x128xf32> to vector<16x128xf32>
    %65 = arith.maximumf %63, %64 : vector<16x128xf32>
    %cst_15 = arith.constant 0.000000e+00 : f32
    %66 = vector.broadcast %cst_15 : f32 to vector<16x128xf32>
    %67 = tpu.concatenate %66, %62, %65, %66 in 0 : vector<16x128xf32>, vector<16x128xf32>, vector<16x128xf32>, vector<16x128xf32> -> vector<64x128xf32>
    %68 = arith.truncf %67 : vector<64x128xf32> to vector<64x128xbf16>
    %69 = vector.extract_strided_slice %68 {offsets = [0, 0], sizes = [32, 128], strides = [1, 1]} : vector<64x128xbf16> to vector<32x128xbf16>
    %70 = vector.extract_strided_slice %68 {offsets = [16, 0], sizes = [32, 128], strides = [1, 1]} : vector<64x128xbf16> to vector<32x128xbf16>
    %71 = vector.extract_strided_slice %68 {offsets = [32, 0], sizes = [32, 128], strides = [1, 1]} : vector<64x128xbf16> to vector<32x128xbf16>
    %72 = tpu.concatenate %69, %70, %71 in 1 : vector<32x128xbf16>, vector<32x128xbf16>, vector<32x128xbf16> -> vector<32x384xbf16>
    %c0_16 = arith.constant 0 : index
    %c0_17 = arith.constant 0 : index
    %73 = vector.load %arg6[%c0_16, %c0_17] : memref<384x256xbf16, #tpu.memory_space<vmem>>, vector<384x256xbf16>
    %cst_18 = arith.constant dense<0.000000e+00> : vector<32x256xf32>
    %74 = tpu.matmul %72, %73, %cst_18 {dimension_numbers = #tpu.dot_dimension_numbers<[1], [0], [0], [1], [0, 0, 1, 1], [], []>} : vector<32x384xbf16>, vector<384x256xbf16>, vector<32x256xf32> -> vector<32x256xf32>
    %c0_19 = arith.constant 0 : index
    %c0_20 = arith.constant 0 : index
    %75 = vector.load %arg7[%c0_19, %c0_20] : memref<1x256xf32, #tpu.memory_space<vmem>>, vector<1x256xf32>
    %76 = vector.broadcast %75 : vector<1x256xf32> to vector<32x256xf32>
    %77 = arith.addf %74, %76 : vector<32x256xf32>
    %cst_21 = arith.constant 0.000000e+00 : f32
    %78 = vector.broadcast %cst_21 : f32 to vector<32x256xf32>
    %79 = arith.maximumf %77, %78 : vector<32x256xf32>
    %80 = vector.extract_strided_slice %79 {offsets = [0, 0], sizes = [32, 128], strides = [1, 1]} : vector<32x256xf32> to vector<32x128xf32>
    %81 = vector.extract_strided_slice %79 {offsets = [0, 128], sizes = [32, 128], strides = [1, 1]} : vector<32x256xf32> to vector<32x128xf32>
    %82 = arith.maximumf %80, %81 : vector<32x128xf32>
    %83 = vector.extract_strided_slice %82 {offsets = [0, 0], sizes = [16, 128], strides = [1, 1]} : vector<32x128xf32> to vector<16x128xf32>
    %84 = vector.extract_strided_slice %82 {offsets = [16, 0], sizes = [16, 128], strides = [1, 1]} : vector<32x128xf32> to vector<16x128xf32>
    %85 = arith.maximumf %83, %84 : vector<16x128xf32>
    %c0_22 = arith.constant 0 : index
    %c0_23 = arith.constant 0 : index
    %86 = vector.load %arg9[%c0_22, %c0_23] : memref<1x128xf32, #tpu.memory_space<vmem>>, vector<1x128xf32>
    %87 = arith.truncf %85 : vector<16x128xf32> to vector<16x128xbf16>
    %c0_24 = arith.constant 0 : index
    %c0_25 = arith.constant 0 : index
    %c0_26 = arith.constant 0 : index
    %88 = vector.load %arg8[%c0_24, %c0_25, %c0_26] : memref<1x128x128xbf16, #tpu.memory_space<vmem>>, vector<1x128x128xbf16>
    %89 = vector.shape_cast %88 : vector<1x128x128xbf16> to vector<128x128xbf16>
    %cst_27 = arith.constant dense<0.000000e+00> : vector<16x128xf32>
    %90 = tpu.matmul %87, %89, %cst_27 {dimension_numbers = #tpu.dot_dimension_numbers<[1], [0], [0], [1], [0, 0, 1, 1], [], []>} : vector<16x128xbf16>, vector<128x128xbf16>, vector<16x128xf32> -> vector<16x128xf32>
    %91 = vector.broadcast %86 : vector<1x128xf32> to vector<16x128xf32>
    %92 = arith.addf %91, %90 : vector<16x128xf32>
    %93 = arith.truncf %92 : vector<16x128xf32> to vector<16x128xbf16>
    %c0_28 = arith.constant 0 : index
    %c0_29 = arith.constant 0 : index
    %94 = vector.load %arg10[%c0_28, %c0_29] : memref<128x128xbf16, #tpu.memory_space<vmem>>, vector<128x128xbf16>
    %cst_30 = arith.constant dense<0.000000e+00> : vector<16x128xf32>
    %95 = tpu.matmul %93, %94, %cst_30 {dimension_numbers = #tpu.dot_dimension_numbers<[1], [0], [0], [1], [0, 0, 1, 1], [], []>} : vector<16x128xbf16>, vector<128x128xbf16>, vector<16x128xf32> -> vector<16x128xf32>
    %c0_31 = arith.constant 0 : index
    %c0_32 = arith.constant 0 : index
    %96 = vector.load %arg11[%c0_31, %c0_32] : memref<1x128xf32, #tpu.memory_space<vmem>>, vector<1x128xf32>
    %97 = vector.broadcast %96 : vector<1x128xf32> to vector<16x128xf32>
    %98 = arith.addf %95, %97 : vector<16x128xf32>
    %c0_33 = arith.constant 0 : index
    %c0_34 = arith.constant 0 : index
    %c0_35 = arith.constant 0 : index
    %99 = vector.load %arg12[%c0_33, %c0_34, %c0_35] : memref<1x16x128xf32, #tpu.memory_space<vmem>>, vector<1x16x128xf32>
    %100 = vector.shape_cast %99 : vector<1x16x128xf32> to vector<16x128xf32>
    %101 = vector.shape_cast %98 : vector<16x128xf32> to vector<1x16x128xf32>
    tpu.vector_store %arg12[%c0_33, %c0_34, %c0_35], %101 {strides = array<i32>} : memref<1x16x128xf32, #tpu.memory_space<vmem>>, vector<1x16x128xf32>,
    return
  }
  func.func @transform_0(%arg0: i32) -> (i32, i32, i32) {
    %c0_i32 = arith.constant 0 : i32
    %c0_i32_0 = arith.constant 0 : i32
    %c0_i32_1 = arith.constant 0 : i32
    return %arg0, %c0_i32, %c0_i32_0 : i32, i32, i32
  }
  func.func @transform_1(%arg0: i32) -> (i32, i32) {
    %c0_i32 = arith.constant 0 : i32
    %c0_i32_0 = arith.constant 0 : i32
    %c0_i32_1 = arith.constant 0 : i32
    return %c0_i32, %c0_i32_0 : i32, i32
  }
  func.func @transform_2(%arg0: i32) -> (i32, i32) {
    %c0_i32 = arith.constant 0 : i32
    %c0_i32_0 = arith.constant 0 : i32
    %c0_i32_1 = arith.constant 0 : i32
    return %c0_i32, %c0_i32_0 : i32, i32
  }
  func.func @transform_3(%arg0: i32) -> (i32, i32) {
    %c0_i32 = arith.constant 0 : i32
    %c0_i32_0 = arith.constant 0 : i32
    %c0_i32_1 = arith.constant 0 : i32
    return %c0_i32, %c0_i32_0 : i32, i32
  }
  func.func @transform_4(%arg0: i32) -> (i32, i32) {
    %c0_i32 = arith.constant 0 : i32
    %c0_i32_0 = arith.constant 0 : i32
    %c0_i32_1 = arith.constant 0 : i32
    return %c0_i32, %c0_i32_0 : i32, i32
  }
  func.func @transform_5(%arg0: i32) -> (i32, i32) {
    %c0_i32 = arith.constant 0 : i32
    %c0_i32_0 = arith.constant 0 : i32
    %c0_i32_1 = arith.constant 0 : i32
    return %c0_i32, %c0_i32_0 : i32, i32
  }
  func.func @transform_6(%arg0: i32) -> (i32, i32) {
    %c0_i32 = arith.constant 0 : i32
    %c0_i32_0 = arith.constant 0 : i32
    %c0_i32_1 = arith.constant 0 : i32
    return %c0_i32, %c0_i32_0 : i32, i32
  }
  func.func @transform_7(%arg0: i32) -> (i32, i32, i32) {
    %c0_i32 = arith.constant 0 : i32
    %c0_i32_0 = arith.constant 0 : i32
    %c0_i32_1 = arith.constant 0 : i32
    %c0_i32_2 = arith.constant 0 : i32
    return %c0_i32, %c0_i32_0, %c0_i32_1 : i32, i32, i32
  }
  func.func @transform_8(%arg0: i32) -> (i32, i32) {
    %c0_i32 = arith.constant 0 : i32
    %c0_i32_0 = arith.constant 0 : i32
    %c0_i32_1 = arith.constant 0 : i32
    return %c0_i32, %c0_i32_0 : i32, i32
  }
  func.func @transform_9(%arg0: i32) -> (i32, i32) {
    %c0_i32 = arith.constant 0 : i32
    %c0_i32_0 = arith.constant 0 : i32
    %c0_i32_1 = arith.constant 0 : i32
    return %c0_i32, %c0_i32_0 : i32, i32
  }
  func.func @transform_10(%arg0: i32) -> (i32, i32) {
    %c0_i32 = arith.constant 0 : i32
    %c0_i32_0 = arith.constant 0 : i32
    %c0_i32_1 = arith.constant 0 : i32
    return %c0_i32, %c0_i32_0 : i32, i32
  }
  func.func @transform_11(%arg0: i32) -> (i32, i32, i32) {
    %c0_i32 = arith.constant 0 : i32
    %c0_i32_0 = arith.constant 0 : i32
    %c0_i32_1 = arith.constant 0 : i32
    return %arg0, %c0_i32, %c0_i32_0 : i32, i32, i32
  }
}

</mosaic_0001>

<bundles_post_ra>
// kernel: forward.1
= control target key start
LH: loop header
LB: loop body
LE: loop exit
PB: predicated region body
PF: predicated region fallthrough
CT: control target
= control target key end

     0   :  { %s3838_s17 = smov 0   ;;  %s5202_s0 = inlined_call_operand.vmem [shape: bf16[2,256,128], index: 0, kind: input, shape index: {}]   ;;  %s5203_s1 = inlined_call_operand.vmem [shape: bf16[640,256], index: 1, kind: input, shape index: {}]   ;;  %s5204_s2 = inlined_call_operand.vmem [shape: f32[1,256], index: 2, kind: input, shape index: {}]   ;;  %s5205_s3 = inlined_call_operand.vmem [shape: bf16[640,256], index: 3, kind: input, shape index: {}]   ;;  %s5206_s4 = inlined_call_operand.vmem [shape: f32[1,256], index: 4, kind: input, shape index: {}]   ;;  %s5207_s5 = inlined_call_operand.vmem [shape: bf16[384,256], index: 5, kind: input, shape index: {}]   ;;  %s5208_s6 = inlined_call_operand.vmem [shape: f32[1,256], index: 6, kind: input, shape index: {}]   ;;  %s5209_s7 = inlined_call_operand.vmem [shape: bf16[1,128,128], index: 7, kind: input, shape index: {}]   ;;  %s5210_s8 = inlined_call_operand.vmem [shape: f32[1,128], index: 8, kind: input, shape index: {}]   ;;  %s5211_s9 = inlined_call_operand.vmem [shape: bf16[128,128], index: 9, kind: input, shape index: {}]   ;;  %s5212_s10 = inlined_call_operand.vmem [shape: f32[1,128], index: 10, kind: input, shape index: {}]   ;;  %s5213_s11 = inlined_call_operand.vmem [shape: f32[2,16,128], index: 11, kind: output, shape index: {}]  }
   0x1 LB: > { %s3097_s18 = sadd.s32 4294967295, %s3772_s17   ;;  %p3101_p0 = scmp.ge.s32.totalorder %s3772_s17, 1  ;;  %s3772_s17 = sphi %s3838_s17, %s21_s17  }
   0x2   : > { %p337_p1 = scmp.lt.s32.totalorder %s3772_s17, 3 }
   0x4   : > { %p338_p2 = pnand %p3101_p0, %p337_p1 }
   0x6   : > { %341 = sbr.rel (%p338_p2) target bundleno = 1386 (0x56a), region = 64 }
   0xb   : > { %v3422_v0 = vld [vmem:[%s5203_s1 + $0x74] ss:$8 sps:$4 sm:$0xff]   ;;  %v3424_v1 = vld [vmem:[%s5203_s1 + $0x70] ss:$8 sps:$4 sm:$0xff]   ;;  %v3428_v4 = vld [vmem:[%s5203_s1 + $0x64] ss:$8 sps:$4 sm:$0xff]  }
   0xc   : > { %1008 = vmatprep.subr.bf16.mxu0 %v3422_v0  ;;  %v3425_v2 = vld [vmem:[%s5203_s1 + $0x174] ss:$8 sps:$4 sm:$0xff]   ;;  %v3427_v3 = vld [vmem:[%s5203_s1 + $0x170] ss:$8 sps:$4 sm:$0xff]   ;;  %v3430_v5 = vld [vmem:[%s5203_s1 + $0x60] ss:$8 sps:$4 sm:$0xff]  }
   0xd   : > { %1009 = vmatpush1.bf16.msra.mxu0 %v3424_v1  ;;  %1181 = vmatprep.subr.bf16.mxu1 %v3425_v2  ;;  %v3431_v6 = vld [vmem:[%s5203_s1 + $0x164] ss:$8 sps:$4 sm:$0xff]   ;;  %v3433_v7 = vld [vmem:[%s5203_s1 + $0x160] ss:$8 sps:$4 sm:$0xff]   ;;  %v3434_v8 = vld [vmem:[%s5203_s1 + $0x54] ss:$8 sps:$4 sm:$0xff]  }
   0xe   : > { %1182 = vmatpush1.bf16.msra.mxu1 %v3427_v3  ;;  %1010 = vmatprep.subr.bf16.mxu0 %v3428_v4  ;;  %v3436_v9 = vld [vmem:[%s5203_s1 + $0x50] ss:$8 sps:$4 sm:$0xff]   ;;  %v3437_v10 = vld [vmem:[%s5203_s1 + $0x154] ss:$8 sps:$4 sm:$0xff]   ;;  %v3440_v11 = vld [vmem:[%s5203_s1 + $0x44] ss:$8 sps:$4 sm:$0xff]  }
   0xf   : > { %1183 = vmatprep.subr.bf16.mxu1 %v3431_v6  ;;  %v3439_v12 = vld [vmem:[%s5203_s1 + $0x150] ss:$8 sps:$4 sm:$0xff]   ;;  %v3443_v13 = vld [vmem:[%s5203_s1 + $0x144] ss:$8 sps:$4 sm:$0xff]   ;;  %v3442_v14 = vld [vmem:[%s5203_s1 + $0x40] ss:$8 sps:$4 sm:$0xff]  }
  0x10   : > { %v3446_v15 = vld [vmem:[%s5203_s1 + $0x34] ss:$8 sps:$4 sm:$0xff]   ;;  %v3445_v16 = vld [vmem:[%s5203_s1 + $0x140] ss:$8 sps:$4 sm:$0xff]   ;;  %v3448_v18 = vld [vmem:[%s5203_s1 + $0x30] ss:$8 sps:$4 sm:$0xff]  }
  0x11   : > { %1011 = vmatpush1.bf16.msra.mxu0 %v3430_v5  ;;  %v3449_v17 = vld [vmem:[%s5203_s1 + $0x134] ss:$8 sps:$4 sm:$0xff]   ;;  %v3452_v19 = vld [vmem:[%s5203_s1 + $0x24] ss:$8 sps:$4 sm:$0xff]   ;;  %v3451_v20 = vld [vmem:[%s5203_s1 + $0x130] ss:$8 sps:$4 sm:$0xff]  }
  0x12   : > { %1012 = vmatprep.subr.bf16.mxu0 %v3434_v8  ;;  %1184 = vmatpush1.bf16.msra.mxu1 %v3433_v7  ;;  %v3455_v21 = vld [vmem:[%s5203_s1 + $0x124] ss:$8 sps:$4 sm:$0xff]   ;;  %v3454_v22 = vld [vmem:[%s5203_s1 + $0x20] ss:$8 sps:$4 sm:$0xff]   ;;  %v3458_v23 = vld [vmem:[%s5203_s1 + $0x14] ss:$8 sps:$4 sm:$0xff]  }
  0x13   : > { %1185 = vmatprep.subr.bf16.mxu1 %v3437_v10  ;;  %v3457_v24 = vld [vmem:[%s5203_s1 + $0x120] ss:$8 sps:$4 sm:$0xff]   ;;  %v3461_v25 = vld [vmem:[%s5203_s1 + $0x114] ss:$8 sps:$4 sm:$0xff]   ;;  %v3460_v26 = vld [vmem:[%s5203_s1 + $0x10] ss:$8 sps:$4 sm:$0xff]  }
  0x14   : > { %v3464_v27 = vld [vmem:[%s5203_s1 + $0x4] ss:$8 sps:$4 sm:$0xff]   ;;  %v3463_v28 = vld [vmem:[%s5203_s1 + $0x110] ss:$8 sps:$4 sm:$0xff]   ;;  %v3466_v30 = vld [vmem:[%s5203_s1] ss:$8 sps:$4 sm:$0xff]  }
  0x15   : > { %1013 = vmatpush1.bf16.msra.mxu0 %v3436_v9  ;;  %v3467_v29 = vld [vmem:[%s5203_s1 + $0x104] ss:$8 sps:$4 sm:$0xff]   ;;  %v3470_v31 = vld [vmem:[%s5203_s1 + $0xf4] ss:$8 sps:$4 sm:$0xff]   ;;  %v3469_v32 = vld [vmem:[%s5203_s1 + $0x100] ss:$8 sps:$4 sm:$0xff]  }
  0x16   : > { %1014 = vmatprep.subr.bf16.mxu0 %v3440_v11  ;;  %1186 = vmatpush1.bf16.msra.mxu1 %v3439_v12  ;;  %p377_p3 = scmp.lt.s32.totalorder %s3097_s18, 1  ;;  %v3473_v33 = vld [vmem:[%s5203_s1 + $0x1f4] ss:$8 sps:$4 sm:$0xff]   ;;  %v3472_v34 = vld [vmem:[%s5203_s1 + $0xf0] ss:$8 sps:$4 sm:$0xff]   ;;  %v5214_v7 = vmov 0  }
  0x17   : > { %1187 = vmatprep.subr.bf16.mxu1 %v3443_v13  ;;  %v3476_v35 = vld [vmem:[%s5203_s1 + $0xe4] ss:$8 sps:$4 sm:$0xff]   ;;  %v3475_v36 = vld [vmem:[%s5203_s1 + $0x1f0] ss:$8 sps:$4 sm:$0xff]   ;;  %v3478_v38 = vld [vmem:[%s5203_s1 + $0xe0] ss:$8 sps:$4 sm:$0xff]  }
  0x18   : > { %s5298_s18 = smov (!%p377_p3, %s3097_s18), 1  ;;  %v3479_v37 = vld [vmem:[%s5203_s1 + $0x1e4] ss:$8 sps:$4 sm:$0xff]   ;;  %v3482_v39 = vld [vmem:[%s5203_s1 + $0xd4] ss:$8 sps:$4 sm:$0xff]   ;;  %vm3777_vm0 = vmmov 0  }
  0x19   : > { %1015 = vmatpush1.bf16.msra.mxu0 %v3442_v14  ;;  %v3481_v40 = vld [vmem:[%s5203_s1 + $0x1e0] ss:$8 sps:$4 sm:$0xff]   ;;  %s3350_s14 = sshll.u32 %s5298_s18, 7  ;;  %v3485_v41 = vld [vmem:[%s5203_s1 + $0x1d4] ss:$8 sps:$4 sm:$0xff]   ;;  %s3351_s23 = sshll.u32 %s5298_s18, 4 }
  0x1a   : > { %1016 = vmatprep.subr.bf16.mxu0 %v3446_v15  ;;  %1188 = vmatpush1.bf16.msra.mxu1 %v3445_v16  ;;  %v3484_v42 = vld [vmem:[%s5203_s1 + $0xd0] ss:$8 sps:$4 sm:$0xff]   ;;  %v3488_v43 = vld [vmem:[%s5203_s1 + $0xc4] ss:$8 sps:$4 sm:$0xff]   ;;  %s3988_s25 = scalar_lea.vmem %s5202_s0, %s3350_s14  ;;  %v3490_v46 = vld [vmem:[%s5203_s1 + $0xc0] ss:$8 sps:$4 sm:$0xff]   ;;  %s386_s29 = scalar_lea.vmem %s5213_s11, %s3351_s23 }
  0x1b   : > { %1189 = vmatprep.subr.bf16.mxu1 %v3449_v17  ;;  %v3487_v44 = vld [vmem:[%s5203_s1 + $0x1d0] ss:$8 sps:$4 sm:$0xff]   ;;  %v3491_v45 = vld [vmem:[%s5203_s1 + $0x1c4] ss:$8 sps:$4 sm:$0xff]   ;;  %v3493_v48 = vld [vmem:[%s5203_s1 + $0x1c0] ss:$8 sps:$4 sm:$0xff]  }
  0x1c   : > { %v3517_v47 = vld [vmem:[%s3988_s25] sm:$0xff]   ;;  %v3494_v49 = vld [vmem:[%s5203_s1 + $0xb4] ss:$8 sps:$4 sm:$0xff]   ;;  %v3496_v52 = vld [vmem:[%s5203_s1 + $0xb0] ss:$8 sps:$4 sm:$0xff]  }
  0x1d   : > { %1017 = vmatpush1.bf16.msra.mxu0 %v3448_v18  ;;  %1040 = vmatprep.mubr.bf16.mxu0 %v3517_v47  ;;  %v4007_v50 = vld [vmem:[%s3988_s25 + $0x10] sm:$0xff]   ;;  %v3500_v53 = vld [vmem:[%s5203_s1 + $0xa4] ss:$8 sps:$4 sm:$0xff]   ;;  %v3502_v56 = vld [vmem:[%s5203_s1 + $0xa0] ss:$8 sps:$4 sm:$0xff]  }
  0x1e   : > { %1018 = vmatprep.subr.bf16.mxu0 %v3452_v19  ;;  %1190 = vmatpush1.bf16.msra.mxu1 %v3451_v20  ;;  %v3497_v51 = vld [vmem:[%s5203_s1 + $0x1b4] ss:$8 sps:$4 sm:$0xff]   ;;  %v3499_v54 = vld [vmem:[%s5203_s1 + $0x1b0] ss:$8 sps:$4 sm:$0xff]   ;;  %v3503_v55 = vld [vmem:[%s5203_s1 + $0x1a4] ss:$8 sps:$4 sm:$0xff]  }
  0x1f   : > { %1191 = vmatprep.subr.bf16.mxu1 %v3455_v21  ;;  %1213 = vmatprep.mubr.bf16.mxu1 %v4007_v50  ;;  %v3506_v57 = vld [vmem:[%s5203_s1 + $0x94] ss:$8 sps:$4 sm:$0xff]   ;;  %v3505_v58 = vld [vmem:[%s5203_s1 + $0x1a0] ss:$8 sps:$4 sm:$0xff]   ;;  %v3508_v60 = vld [vmem:[%s5203_s1 + $0x90] ss:$8 sps:$4 sm:$0xff]  }
  0x20   : > { %v3509_v59 = vld [vmem:[%s5203_s1 + $0x194] ss:$8 sps:$4 sm:$0xff]   ;;  %v3512_v61 = vld [vmem:[%s5203_s1 + $0x84] ss:$8 sps:$4 sm:$0xff]   ;;  %v3511_v62 = vld [vmem:[%s5203_s1 + $0x190] ss:$8 sps:$4 sm:$0xff]  }
  0x21   : > { %1019 = vmatpush1.bf16.msra.mxu0 %v3454_v22  ;;  %v3515_v63 = vld [vmem:[%s5203_s1 + $0x184] ss:$8 sps:$4 sm:$0xff]   ;;  %v3514_v0 = vld [vmem:[%s5203_s1 + $0x80] ss:$8 sps:$4 sm:$0xff]   ;;  %v3521_v1 = vld [vmem:[%s5203_s1 + $0x274] ss:$8 sps:$4 sm:$0xff]  }
  0x22   : > { %1020 = vmatprep.subr.bf16.mxu0 %v3458_v23  ;;  %1192 = vmatpush1.bf16.msra.mxu1 %v3457_v24  ;;  %v3518_v2 = vld [vmem:[%s5203_s1 + $0x180] ss:$8 sps:$4 sm:$0xff]   ;;  %v3519_v3 = vld [vmem:[%s5203_s1 + $0x270] ss:$8 sps:$4 sm:$0xff]   ;;  %v3527_v5 = vld [vmem:[%s5203_s1 + $0x264] ss:$8 sps:$4 sm:$0xff]  }
  0x23   : > { %1193 = vmatprep.subr.bf16.mxu1 %v3461_v25  ;;  %v3523_v4 = vld [vmem:[%s3988_s25 + $0x8] sm:$0xff]   ;;  %v4066_v6 = vld [vmem:[%s3988_s25 + $0x18] sm:$0xff]   ;;  %v4083_v12 = vld [vmem:[%s3988_s25 + $0x20] sm:$0xff]  }
  0x24   : > { %v3525_v8 = vld [vmem:[%s5203_s1 + $0x260] ss:$8 sps:$4 sm:$0xff]   ;;  %v3532_v9 = vld [vmem:[%s5203_s1 + $0x254] ss:$8 sps:$4 sm:$0xff]   ;;  %v3530_v10 = vld [vmem:[%s5203_s1 + $0x250] ss:$8 sps:$4 sm:$0xff]  }
  0x25   : > { %1021 = vmatpush1.bf16.msra.mxu0 %v3460_v26  ;;  %v3537_v11 = vld [vmem:[%s5203_s1 + $0x244] ss:$8 sps:$4 sm:$0xff]   ;;  %v3535_v13 = vld [vmem:[%s5203_s1 + $0x240] ss:$8 sps:$4 sm:$0xff]   ;;  %v3541_v14 = vld [vmem:[%s5203_s1 + $0x234] ss:$8 sps:$4 sm:$0xff]  }
  0x26   : > { %1022 = vmatprep.subr.bf16.mxu0 %v3464_v27  ;;  %1194 = vmatpush1.bf16.msra.mxu1 %v3463_v28  ;;  %v3539_v15 = vld [vmem:[%s5203_s1 + $0x230] ss:$8 sps:$4 sm:$0xff]   ;;  %v3546_v16 = vld [vmem:[%s5203_s1 + $0x224] ss:$8 sps:$4 sm:$0xff]   ;;  %v3544_v18 = vld [vmem:[%s5203_s1 + $0x220] ss:$8 sps:$4 sm:$0xff]  }
  0x27   : > { %1195 = vmatprep.subr.bf16.mxu1 %v3467_v29  ;;  %v4101_v17 = vld [vmem:[%s3988_s25 + $0x28] sm:$0xff]   ;;  %v3551_v19 = vld [vmem:[%s5203_s1 + $0x214] ss:$8 sps:$4 sm:$0xff]   ;;  %v3549_v20 = vld [vmem:[%s5203_s1 + $0x210] ss:$8 sps:$4 sm:$0xff]  }
  0x28   : > { %v3556_v21 = vld [vmem:[%s5203_s1 + $0x204] ss:$8 sps:$4 sm:$0xff]   ;;  %v4119_v22 = vld [vmem:[%s3988_s25 + $0x30] sm:$0xff]   ;;  %v3554_v23 = vld [vmem:[%s5203_s1 + $0x200] ss:$8 sps:$4 sm:$0xff]  }
  0x29   : > { %1023 = vmatpush1.bf16.msra.mxu0 %v3466_v30  ;;  %v4129_v24 = vld [vmem:[%s3988_s25 + $0x38] sm:$0xff]   ;;  %v4136_v25 = vld [vmem:[%s3988_s25 + $0x40] sm:$0xff]   ;;  %v4143_v26 = vld [vmem:[%s3988_s25 + $0x48] sm:$0xff]  }
  0x2a   : > { %1024 = vmatprep.subr.bf16.mxu0 %v3470_v31  ;;  %1196 = vmatpush1.bf16.msra.mxu1 %v3469_v32  ;;  %v4150_v27 = vld [vmem:[%s3988_s25 + $0x50] sm:$0xff]   ;;  %v4157_v28 = vld [vmem:[%s3988_s25 + $0x58] sm:$0xff]   ;;  %v4164_v29 = vld [vmem:[%s3988_s25 + $0x60] sm:$0xff]  }
  0x2b   : > { %1197 = vmatprep.subr.bf16.mxu1 %v3473_v33  ;;  %v4171_v30 = vld [vmem:[%s3988_s25 + $0x68] sm:$0xff]   ;;  %v4178_v31 = vld [vmem:[%s3988_s25 + $0x70] sm:$0xff]   ;;  %v4185_v32 = vld [vmem:[%s3988_s25 + $0x78] sm:$0xff]  }
  0x2c   : > { %v3558_v33 = vld [vmem:[%s5205_s3 + $0x70] ss:$8 sps:$4 sm:$0xff]  }
  0x2d   : > { %1025 = vmatpush2.bf16.msra.mxu0 %v3472_v34  ;;  %v3560_v34 = vld [vmem:[%s5205_s3 + $0x74] ss:$8 sps:$4 sm:$0xff]  }
  0x2e   : > { %1026 = vmatprep.subr.bf16.mxu0 %v3476_v35  ;;  %1198 = vmatpush2.bf16.msra.mxu1 %v3475_v36  ;;  %v3561_v35 = vld [vmem:[%s5205_s3 + $0x60] ss:$8 sps:$4 sm:$0xff]   ;;  %v3563_v36 = vld [vmem:[%s5205_s3 + $0x64] ss:$8 sps:$4 sm:$0xff]  }
  0x2f   : > { %1199 = vmatprep.subr.bf16.mxu1 %v3479_v37  ;;  %v3564_v37 = vld [vmem:[%s5205_s3 + $0x50] ss:$8 sps:$4 sm:$0xff]  }
  0x31   : > { %1027 = vmatpush2.bf16.msra.mxu0 %v3478_v38  ;;  %v3566_v38 = vld [vmem:[%s5205_s3 + $0x54] ss:$8 sps:$4 sm:$0xff]  }
  0x32   : > { %1028 = vmatprep.subr.bf16.mxu0 %v3482_v39  ;;  %1200 = vmatpush2.bf16.msra.mxu1 %v3481_v40  ;;  %v3567_v39 = vld [vmem:[%s5205_s3 + $0x40] ss:$8 sps:$4 sm:$0xff]   ;;  %v3569_v40 = vld [vmem:[%s5205_s3 + $0x44] ss:$8 sps:$4 sm:$0xff]  }
  0x33   : > { %1201 = vmatprep.subr.bf16.mxu1 %v3485_v41  ;;  %v3570_v41 = vld [vmem:[%s5205_s3 + $0x30] ss:$8 sps:$4 sm:$0xff]  }
  0x35   : > { %1029 = vmatpush2.bf16.msra.mxu0 %v3484_v42  ;;  %v3572_v42 = vld [vmem:[%s5205_s3 + $0x34] ss:$8 sps:$4 sm:$0xff]  }
  0x36   : > { %1030 = vmatprep.subr.bf16.mxu0 %v3488_v43  ;;  %1202 = vmatpush2.bf16.msra.mxu1 %v3487_v44  ;;  %v3573_v43 = vld [vmem:[%s5205_s3 + $0x20] ss:$8 sps:$4 sm:$0xff]   ;;  %v3575_v44 = vld [vmem:[%s5205_s3 + $0x24] ss:$8 sps:$4 sm:$0xff]  }
  0x37   : > { %1203 = vmatprep.subr.bf16.mxu1 %v3491_v45  ;;  %v3576_v45 = vld [vmem:[%s5205_s3 + $0x10] ss:$8 sps:$4 sm:$0xff]  }
  0x39   : > { %1031 = vmatpush2.bf16.msra.mxu0 %v3490_v46  ;;  %v3578_v46 = vld [vmem:[%s5205_s3 + $0x14] ss:$8 sps:$4 sm:$0xff]  }
  0x3a   : > { %1032 = vmatprep.subr.bf16.mxu0 %v3494_v49  ;;  %1204 = vmatpush2.bf16.msra.mxu1 %v3493_v48  ;;  %v3581_v48 = vld [vmem:[%s5205_s3 + $0x4] ss:$8 sps:$4 sm:$0xff]   ;;  %v3582_v49 = vld [vmem:[%s5205_s3 + $0xf0] ss:$8 sps:$4 sm:$0xff]  }
  0x3b   : > { %1205 = vmatprep.subr.bf16.mxu1 %v3497_v51  ;;  %v3585_v51 = vld [vmem:[%s5205_s3 + $0xe0] ss:$8 sps:$4 sm:$0xff]  }
  0x3d   : > { %1033 = vmatpush2.bf16.msra.mxu0 %v3496_v52  ;;  %v3587_v52 = vld [vmem:[%s5205_s3 + $0xe4] ss:$8 sps:$4 sm:$0xff]  }
  0x3e   : > { %1034 = vmatprep.subr.bf16.mxu0 %v3500_v53  ;;  %1206 = vmatpush2.bf16.msra.mxu1 %v3499_v54  ;;  %v3588_v53 = vld [vmem:[%s5205_s3 + $0xd0] ss:$8 sps:$4 sm:$0xff]   ;;  %v3590_v54 = vld [vmem:[%s5205_s3 + $0xd4] ss:$8 sps:$4 sm:$0xff]  }
  0x3f   : > { %1207 = vmatprep.subr.bf16.mxu1 %v3503_v55  ;;  %v3591_v55 = vld [vmem:[%s5205_s3 + $0xc0] ss:$8 sps:$4 sm:$0xff]  }
  0x41   : > { %1035 = vmatpush2.bf16.msra.mxu0 %v3502_v56  ;;  %v3593_v56 = vld [vmem:[%s5205_s3 + $0xc4] ss:$8 sps:$4 sm:$0xff]  }
  0x42   : > { %1036 = vmatprep.subr.bf16.mxu0 %v3506_v57  ;;  %1208 = vmatpush2.bf16.msra.mxu1 %v3505_v58  ;;  %v3594_v57 = vld [vmem:[%s5205_s3 + $0xb0] ss:$8 sps:$4 sm:$0xff]   ;;  %v3596_v58 = vld [vmem:[%s5205_s3 + $0xb4] ss:$8 sps:$4 sm:$0xff]  }
  0x43   : > { %1209 = vmatprep.subr.bf16.mxu1 %v3509_v59  ;;  %v3599_v59 = vld [vmem:[%s5205_s3 + $0xa4] ss:$8 sps:$4 sm:$0xff]  }
  0x45   : > { %1037 = vmatpush2.bf16.msra.mxu0 %v3508_v60 }
  0x46   : > { %1038 = vmatprep.subr.bf16.mxu0 %v3512_v61  ;;  %1210 = vmatpush2.bf16.msra.mxu1 %v3511_v62  ;;  %v3597_v61 = vld [vmem:[%s5205_s3 + $0xa0] ss:$8 sps:$4 sm:$0xff]  }
  0x47   : > { %1211 = vmatprep.subr.bf16.mxu1 %v3515_v63 }
  0x49   : > { %1039 = vmatpush2.bf16.msra.mxu0 %v3514_v0  ;;  %v3602_v0 = vld [vmem:[%s5205_s3 + $0x94] ss:$8 sps:$4 sm:$0xff]  }
  0x4a   : > { %1354 = vmatprep.subr.bf16.mxu0 %v3521_v1  ;;  %1212 = vmatpush2.bf16.msra.mxu1 %v3518_v2 }
  0x4b   : > { %2125 = vmatprep.subr.bf16.mxu1 %v3560_v34 }
  0x4c   : > { %1041 = vmatmul.mubr.bf16.vlgmr.msra.gmra.mxu0 %v5214_v7 }
  0x4d   : > { %1355 = vmatpush1.bf16.msra.mxu0 %v3519_v3  ;;  %1050 = vmatprep.mubr.bf16.mxu0 %v3523_v4  ;;  %v3600_v3 = vld [vmem:[%s5205_s3 + $0x90] ss:$8 sps:$4 sm:$0xff]  }
  0x4e   : > { %1214 = vmatmul.mubr.bf16.vlgmr.msra.gmra.mxu1 %v3523_v4  ;;  %1356 = vmatprep.subr.bf16.mxu0 %v3527_v5 }
  0x4f   : > { %1223 = vmatprep.mubr.bf16.mxu1 %v4066_v6  ;;  %2126 = vmatpush1.bf16.msra.mxu1 %v3558_v33 }
  0x50   : > { %2127 = vmatprep.subr.bf16.mxu1 %v3563_v36 }
  0x51   : > { %1357 = vmatpush1.bf16.msra.mxu0 %v3525_v8 }
  0x52   : > { %1358 = vmatprep.subr.bf16.mxu0 %v3532_v9  ;;  %v3603_v9 = vld [vmem:[%s5205_s3 + $0x80] ss:$8 sps:$4 sm:$0xff]  }
  0x53   : > { %2128 = vmatpush1.bf16.msra.mxu1 %v3561_v35 }
  0x54   : > { %1051 = vmatmul.mubr.bf16.gmra.mxu0 %v3517_v47  ;;  %2129 = vmatprep.subr.bf16.mxu1 %v3566_v38  ;;  %v3579_v47 = vld [vmem:[%s5205_s3] ss:$8 sps:$4 sm:$0xff]  }
  0x55   : > { %1060 = vmatprep.mubr.bf16.mxu0 %v4007_v50  ;;  %1359 = vmatpush1.bf16.msra.mxu0 %v3530_v10 }
  0x56   : > { %1224 = vmatmul.mubr.bf16.gmra.mxu1 %v4007_v50  ;;  %1360 = vmatprep.subr.bf16.mxu0 %v3537_v11 }
  0x57   : > { %1233 = vmatprep.mubr.bf16.mxu1 %v4083_v12  ;;  %2130 = vmatpush1.bf16.msra.mxu1 %v3564_v37 }
  0x58   : > { %2131 = vmatprep.subr.bf16.mxu1 %v3569_v40 }
  0x59   : > { %1361 = vmatpush1.bf16.msra.mxu0 %v3535_v13 }
  0x5a   : > { %1362 = vmatprep.subr.bf16.mxu0 %v3541_v14 }
  0x5b   : > { %2132 = vmatpush1.bf16.msra.mxu1 %v3567_v39 }
  0x5c   : > { %1061 = vmatmul.mubr.bf16.gmra.mxu0 %v3523_v4  ;;  %2133 = vmatprep.subr.bf16.mxu1 %v3572_v42 }
  0x5d   : > { %1070 = vmatprep.mubr.bf16.mxu0 %v4066_v6  ;;  %1363 = vmatpush1.bf16.msra.mxu0 %v3539_v15 }
  0x5e   : > { %1234 = vmatmul.mubr.bf16.gmra.mxu1 %v4066_v6  ;;  %1364 = vmatprep.subr.bf16.mxu0 %v3546_v16  ;;  %v3608_v16 = vld [vmem:[%s5205_s3 + $0x174] ss:$8 sps:$4 sm:$0xff]  }
  0x5f   : > { %1243 = vmatprep.mubr.bf16.mxu1 %v4101_v17  ;;  %2134 = vmatpush1.bf16.msra.mxu1 %v3570_v41 }
  0x60   : > { %2135 = vmatprep.subr.bf16.mxu1 %v3575_v44 }
  0x61   : > { %1365 = vmatpush1.bf16.msra.mxu0 %v3544_v18 }
  0x62   : > { %1366 = vmatprep.subr.bf16.mxu0 %v3551_v19 }
  0x63   : > { %2136 = vmatpush1.bf16.msra.mxu1 %v3573_v43 }
  0x64   : > { %1071 = vmatmul.mubr.bf16.gmra.mxu0 %v4007_v50  ;;  %2137 = vmatprep.subr.bf16.mxu1 %v3578_v46  ;;  %v3584_v50 = vld [vmem:[%s5205_s3 + $0xf4] ss:$8 sps:$4 sm:$0xff]  }
  0x65   : > { %1080 = vmatprep.mubr.bf16.mxu0 %v4083_v12  ;;  %1367 = vmatpush1.bf16.msra.mxu0 %v3549_v20 }
  0x66   : > { %1244 = vmatmul.mubr.bf16.gmra.mxu1 %v4083_v12  ;;  %1368 = vmatprep.subr.bf16.mxu0 %v3556_v21 }
  0x67   : > { %1253 = vmatprep.mubr.bf16.mxu1 %v4119_v22  ;;  %2138 = vmatpush1.bf16.msra.mxu1 %v3576_v45 }
  0x68   : > { %2139 = vmatprep.subr.bf16.mxu1 %v3581_v48 }
  0x69   : > { %1369 = vmatpush1.bf16.msra.mxu0 %v3554_v23 }
  0x6b   : > { %2140 = vmatpush1.bf16.msra.mxu1 %v3579_v47 }
  0x6c   : > { %1081 = vmatmul.mubr.bf16.gmra.mxu0 %v4066_v6  ;;  %2141 = vmatprep.subr.bf16.mxu1 %v3584_v50 }
  0x6d   : > { %1090 = vmatprep.mubr.bf16.mxu0 %v4101_v17 }
  0x6e   : > { %1254 = vmatmul.mubr.bf16.gmra.mxu1 %v4101_v17 }
  0x6f   : > { %1263 = vmatprep.mubr.bf16.mxu1 %v4129_v24  ;;  %2142 = vmatpush2.bf16.msra.mxu1 %v3582_v49 }
  0x70   : > { %2143 = vmatprep.subr.bf16.mxu1 %v3587_v52 }
  0x73   : > { %2144 = vmatpush2.bf16.msra.mxu1 %v3585_v51 }
  0x74   : > { %1091 = vmatmul.mubr.bf16.gmra.mxu0 %v4083_v12  ;;  %2145 = vmatprep.subr.bf16.mxu1 %v3590_v54 }
  0x75   : > { %1100 = vmatprep.mubr.bf16.mxu0 %v4119_v22 }
  0x76   : > { %1264 = vmatmul.mubr.bf16.gmra.mxu1 %v4119_v22 }
  0x77   : > { %1273 = vmatprep.mubr.bf16.mxu1 %v4136_v25  ;;  %2146 = vmatpush2.bf16.msra.mxu1 %v3588_v53 }
  0x78   : > { %2147 = vmatprep.subr.bf16.mxu1 %v3593_v56 }
  0x7b   : > { %2148 = vmatpush2.bf16.msra.mxu1 %v3591_v55 }
  0x7c   : > { %1101 = vmatmul.mubr.bf16.gmra.mxu0 %v4101_v17  ;;  %2149 = vmatprep.subr.bf16.mxu1 %v3596_v58 }
  0x7d   : > { %1110 = vmatprep.mubr.bf16.mxu0 %v4129_v24 }
  0x7e   : > { %1274 = vmatmul.mubr.bf16.gmra.mxu1 %v4129_v24 }
  0x7f   : > { %1283 = vmatprep.mubr.bf16.mxu1 %v4143_v26  ;;  %2150 = vmatpush2.bf16.msra.mxu1 %v3594_v57 }
  0x80   : > { %2151 = vmatprep.subr.bf16.mxu1 %v3599_v59 }
  0x83   : > { %2152 = vmatpush2.bf16.msra.mxu1 %v3597_v61 }
  0x84   : > { %1111 = vmatmul.mubr.bf16.gmra.mxu0 %v4119_v22  ;;  %2153 = vmatprep.subr.bf16.mxu1 %v3602_v0 }
  0x85   : > { %1120 = vmatprep.mubr.bf16.mxu0 %v4136_v25 }
  0x86   : > { %1284 = vmatmul.mubr.bf16.gmra.mxu1 %v4136_v25 }
  0x87   : > { %1293 = vmatprep.mubr.bf16.mxu1 %v4150_v27  ;;  %2154 = vmatpush2.bf16.msra.mxu1 %v3600_v3 }
  0x8c   : > { %1121 = vmatmul.mubr.bf16.gmra.mxu0 %v4129_v24 }
  0x8d   : > { %1130 = vmatprep.mubr.bf16.mxu0 %v4143_v26 }
  0x8e   : > { %1294 = vmatmul.mubr.bf16.gmra.mxu1 %v4143_v26 }
  0x8f   : > { %1303 = vmatprep.mubr.bf16.mxu1 %v4157_v28 }
  0x94   : > { %1131 = vmatmul.mubr.bf16.gmra.mxu0 %v4136_v25 }
  0x95   : > { %1140 = vmatprep.mubr.bf16.mxu0 %v4150_v27 }
  0x96   : > { %1304 = vmatmul.mubr.bf16.gmra.mxu1 %v4150_v27 }
  0x97   : > { %1313 = vmatprep.mubr.bf16.mxu1 %v4164_v29 }
  0x9c   : > { %1141 = vmatmul.mubr.bf16.gmra.mxu0 %v4143_v26 }
  0x9d   : > { %1150 = vmatprep.mubr.bf16.mxu0 %v4157_v28 }
  0x9e   : > { %1314 = vmatmul.mubr.bf16.gmra.mxu1 %v4157_v28 }
  0x9f   : > { %1323 = vmatprep.mubr.bf16.mxu1 %v4171_v30 }
  0xa4   : > { %1151 = vmatmul.mubr.bf16.gmra.mxu0 %v4150_v27 }
  0xa5   : > { %1160 = vmatprep.mubr.bf16.mxu0 %v4164_v29 }
  0xa6   : > { %1324 = vmatmul.mubr.bf16.gmra.mxu1 %v4164_v29 }
  0xa7   : > { %1333 = vmatprep.mubr.bf16.mxu1 %v4178_v31 }
  0xac   : > { %1161 = vmatmul.mubr.bf16.gmra.mxu0 %v4157_v28 }
  0xad   : > { %1170 = vmatprep.mubr.bf16.mxu0 %v4171_v30 }
  0xae   : > { %1334 = vmatmul.mubr.bf16.gmra.mxu1 %v4171_v30 }
  0xaf   : > { %1343 = vmatprep.mubr.bf16.mxu1 %v4185_v32 }
  0xb4   : > { %1171 = vmatmul.mubr.bf16.gmra.mxu0 %v4164_v29 }
  0xb5   : > { %1386 = vmatprep.mubr.bf16.mxu0 %v5214_v7 }
  0xb6   : > { %1344 = vmatmul.mubr.bf16.gmra.mxu1 %v4178_v31 }
  0xbc   : > { %1387 = vmatmul.mubr.bf16.vlgmr.msra.gmra.mxu0 %v4066_v6  ;;  %v3605_v6 = vld [vmem:[%s5205_s3 + $0x84] ss:$8 sps:$4 sm:$0xff]  }
  0xbd   : > { %1396 = vmatprep.mubr.bf16.mxu0 %v5214_v7  ;;  %2155 = vmatprep.subr.bf16.mxu1 %v3605_v6 }
  0xbe   : > { %2156 = vmatpush2.bf16.msra.mxu1 %v3603_v9 }
  0xbf   : > { %2204 = vmatprep.subr.bf16.mxu1 %v3608_v16 }
  0xc4   : > { %1397 = vmatmul.mubr.bf16.gmra.mxu0 %v4083_v12 }
  0xc5   : > { %1406 = vmatprep.mubr.bf16.mxu0 %v5214_v7 }
  0xcc   : > { %1407 = vmatmul.mubr.bf16.gmra.mxu0 %v4101_v17 }
  0xcd   : > { %1416 = vmatprep.mubr.bf16.mxu0 %v5214_v7 }
  0xd4   : > { %1417 = vmatmul.mubr.bf16.gmra.mxu0 %v4119_v22 }
  0xd5   : > { %1426 = vmatprep.mubr.bf16.mxu0 %v5214_v7 }
  0xdc   : > { %1427 = vmatmul.mubr.bf16.gmra.mxu0 %v4129_v24 }
  0xdd   : > { %1436 = vmatprep.mubr.bf16.mxu0 %v5214_v7 }
  0xe4   : > { %1437 = vmatmul.mubr.bf16.gmra.mxu0 %v4136_v25 }
  0xe5   : > { %1446 = vmatprep.mubr.bf16.mxu0 %v5214_v7 }
  0xec   : > { %1447 = vmatmul.mubr.bf16.gmra.mxu0 %v4143_v26 }
  0xed   : > { %1456 = vmatprep.mubr.bf16.mxu0 %v5214_v7 }
  0xf4   : > { %1457 = vmatmul.mubr.bf16.gmra.mxu0 %v4150_v27 }
  0xf5   : > { %1466 = vmatprep.mubr.bf16.mxu0 %v5214_v7 }
  0xfc   : > { %1467 = vmatmul.mubr.bf16.gmra.mxu0 %v4157_v28 }
  0xfd   : > { %1476 = vmatprep.mubr.bf16.mxu0 %v5214_v7 }
 0x104   : > { %1477 = vmatmul.mubr.bf16.gmra.mxu0 %v4164_v29 }
 0x105   : > { %1486 = vmatprep.mubr.bf16.mxu0 %v5214_v7 }
 0x10c   : > { %v4295_v60 = vpop.f32.mrf.mxu0  ;;  %1487 = vmatmul.mubr.bf16.gmra.mxu0 %v4171_v30 }
 0x10d   : > { %1496 = vmatprep.mubr.bf16.mxu0 %v5214_v7 }
 0x10e   : > { %v4302_v62 = vpop.f32.mrf.mxu0  ;;  %v4304_v63 = vpop.f32.mrf.mxu1 }
 0x110   : > { %v4309_v1 = vpop.f32.mrf.mxu0  ;;  %v4311_v2 = vpop.f32.mrf.mxu1 }
 0x112   : > { %v4316_v4 = vpop.f32.mrf.mxu0  ;;  %v4318_v5 = vpop.f32.mrf.mxu1 }
 0x114   : > { %v4323_v8 = vpop.f32.mrf.mxu0  ;;  %1497 = vmatmul.mubr.bf16.gmra.mxu0 %v4178_v31  ;;  %v4330_v10 = vpop.f32.mrf.mxu1 }
 0x115   : > { %1506 = vmatprep.mubr.bf16.mxu0 %v5214_v7 }
 0x116   : > { %v4332_v11 = vpop.f32.mrf.mxu0  ;;  %v4336_v13 = vpop.f32.mrf.mxu1 }
 0x118   : > { %v4334_v12 = vpop.f32.mrf.mxu0  ;;  %v4347_v17 = vpop.f32.mrf.mxu1 }
 0x11a   : > { %v4338_v14 = vpop.f32.mrf.mxu0  ;;  %v4353_v20 = vpop.f32.mrf.mxu1 }
 0x11c   : > { %v4340_v15 = vpop.f32.mrf.mxu0  ;;  %1507 = vmatmul.mubr.bf16.gmra.mxu0 %v4185_v32  ;;  %v4360_v23 = vpop.f32.mrf.mxu1 }
 0x11d   : > { %1516 = vmatprep.mubr.bf16.mxu0 %v5214_v7 }
 0x11e   : > { %v4349_v18 = vpop.f32.mrf.mxu0  ;;  %v4366_v26 = vpop.f32.mrf.mxu1 }
 0x120   : > { %v4351_v19 = vpop.f32.mrf.mxu0  ;;  %v4372_v29 = vpop.f32.mrf.mxu1 }
 0x122   : > { %v4355_v21 = vpop.f32.mrf.mxu0  ;;  %v4378_v32 = vpop.f32.mrf.mxu1 }
 0x124   : > { %v4357_v22 = vpop.f32.mrf.mxu0  ;;  %1517 = vmatmul.mubr.bf16.gmra.mxu0 %v5214_v7  ;;  %v4384_v35 = vpop.f32.mrf.mxu1 }
 0x126   : > { %v4362_v24 = vpop.f32.mrf.mxu0  ;;  %v4390_v38 = vpop.f32.mrf.mxu1 }
 0x128   : > { %v4364_v25 = vpop.f32.mrf.mxu0  ;;  %v4396_v41 = vpop.f32.mrf.mxu1 }
 0x12a   : > { %v4368_v27 = vpop.f32.mrf.mxu0  ;;  %v4402_v44 = vpop.f32.mrf.mxu1 }
 0x12c   : > { %v4370_v28 = vpop.f32.mrf.mxu0  ;;  %v4408_v47 = vpop.f32.mrf.mxu1 }
 0x12e   : > { %v4374_v30 = vpop.f32.mrf.mxu0  ;;  %v4414_v50 = vpop.f32.mrf.mxu1 }
 0x130   : > { %v4376_v31 = vpop.f32.mrf.mxu0  ;;  %v4420_v53 = vpop.f32.mrf.mxu1 }
 0x132   : > { %v4380_v33 = vpop.f32.mrf.mxu0  ;;  %v4426_v56 = vpop.f32.mrf.mxu1 }
 0x134   : > { %v4382_v34 = vpop.f32.mrf.mxu0  ;;  %v4432_v59 = vpop.f32.mrf.mxu1 }
 0x136   : > { %v4386_v36 = vpop.f32.mrf.mxu0  ;;  %v4438_v3 = vpop.f32.mrf.mxu1 }
 0x138   : > { %v4388_v37 = vpop.f32.mrf.mxu0  ;;  %v4444_v16 = vpop.f32.mrf.mxu1 }
 0x13a   : > { %v4392_v39 = vpop.f32.mrf.mxu0 }
 0x13c   : > { %v4394_v40 = vpop.f32.mrf.mxu0 }
 0x13e   : > { %v4398_v42 = vpop.f32.mrf.mxu0 }
 0x140   : > { %v4400_v43 = vpop.f32.mrf.mxu0 }
 0x141   : > { %5220 = vst [vmem:[#allocation2_spill] sm:$0xff] %v4400_v43 }
 0x142   : > { %v4404_v45 = vpop.f32.mrf.mxu0 }
 0x143   : > { %5221 = vst [vmem:[#allocation3_spill] sm:$0xff] %v4404_v45 }
 0x144   : > { %v4406_v46 = vpop.f32.mrf.mxu0 }
 0x145   : > { %5222 = vst [vmem:[#allocation4_spill] sm:$0xff] %v4406_v46 }
 0x146   : > { %v4410_v48 = vpop.f32.mrf.mxu0 }
 0x147   : > { %5223 = vst [vmem:[#allocation5_spill] sm:$0xff] %v4410_v48 }
 0x148   : > { %v4412_v49 = vpop.f32.mrf.mxu0 }
 0x149   : > { %5224 = vst [vmem:[#allocation6_spill] sm:$0xff] %v4412_v49 }
 0x14a   : > { %v4416_v51 = vpop.f32.mrf.mxu0 }
 0x14b   : > { %5225 = vst [vmem:[#allocation7_spill] sm:$0xff] %v4416_v51 }
 0x14c   : > { %v4418_v52 = vpop.f32.mrf.mxu0 }
 0x14d   : > { %5226 = vst [vmem:[#allocation8_spill] sm:$0xff] %v4418_v52  ;;  %v598_v52 = vlaneseq }
 0x14e   : > { %v4422_v54 = vpop.f32.mrf.mxu0 }
 0x14f   : > { %5227 = vst [vmem:[#allocation9_spill] sm:$0xff] %v4422_v54 }
 0x150   : > { %v4424_v55 = vpop.f32.mrf.mxu0 }
 0x151   : > { %5228 = vst [vmem:[#allocation10_spill] sm:$0xff] %v4424_v55 }
 0x152   : > { %v4428_v57 = vpop.f32.mrf.mxu0 }
 0x153   : > { %5229 = vst [vmem:[#allocation11_spill] sm:$0xff] %v4428_v57  ;;  %v4450_v57 = vpop.f32.mrf.mxu1 }
 0x154   : > { %v4430_v58 = vpop.f32.mrf.mxu0 }
 0x155   : > { %5230 = vst [vmem:[#allocation12_spill] sm:$0xff] %v4430_v58 }
 0x156   : > { %v4434_v61 = vpop.f32.mrf.mxu0 }
 0x157   : > { %5231 = vst [vmem:[#allocation13_spill] sm:$0xff] %v4434_v61  ;;  %v4456_v61 = vpop.f32.mrf.mxu1 }
 0x158   : > { %v4436_v0 = vpop.f32.mrf.mxu0 }
 0x159   : > { %5232 = vst [vmem:[#allocation14_spill] sm:$0xff] %v4436_v0 }
 0x15a   : > { %v4440_v6 = vpop.f32.mrf.mxu0 }
 0x15b   : > { %5233 = vst [vmem:[#allocation15_spill] sm:$0xff] %v4440_v6 }
 0x15c   : > { %v4442_v9 = vpop.f32.mrf.mxu0 }
 0x15d   : > { %5234 = vst [vmem:[#allocation16_spill] sm:$0xff] %v4442_v9  ;;  %v4462_v9 = vpop.f32.mrf.mxu1 }
 0x15e   : > { %v4446_v7 = vpop.f32.mrf.mxu0  ;;  %5241 = vst [vmem:[#allocation23_spill] sm:$0xff] %v4462_v9 }
 0x15f   : > { %5235 = vst [vmem:[#allocation17_spill] sm:$0xff] %v4446_v7  ;;  %v599_v7 = vshrl.u32 %v598_v52, 7 }
 0x160   : > { %v4448_v55 = vpop.f32.mrf.mxu0 }
 0x161   : > { %5236 = vst [vmem:[#allocation18_spill] sm:$0xff] %v4448_v55  ;;  %v4468_v55 = vpop.f32.mrf.mxu1 }
 0x162   : > { %v4452_v58 = vpop.f32.mrf.mxu0  ;;  %5244 = vst [vmem:[#allocation26_spill] sm:$0xff] %v4468_v55 }
 0x163   : > { %5237 = vst [vmem:[#allocation19_spill] sm:$0xff] %v4452_v58  ;;  %v4472_v58 = vsub.s32 0, %v599_v7  ;;  %v4481_v46 = vpop.f32.mrf.mxu1 }
 0x164   : > { %v4454_v54 = vpop.f32.mrf.mxu0  ;;  %5249 = vst [vmem:[#allocation31_spill] sm:$0xff] %v4481_v46 }
 0x165   : > { %5238 = vst [vmem:[#allocation20_spill] sm:$0xff] %v4454_v54  ;;  %5246 = vst [vmem:[#allocation28_spill] sm:$0xff] %v4472_v58  ;;  %v4493_v45 = vpop.f32.mrf.mxu1 }
 0x166   : > { %v4458_v0 = vpop.f32.mrf.mxu0  ;;  %5252 = vst [vmem:[#allocation34_spill] sm:$0xff] %v4493_v45 }
 0x167   : > { %5239 = vst [vmem:[#allocation21_spill] sm:$0xff] %v4458_v0  ;;  %v596_v0 = vld [vmem:[%s5204_s2] sm:$0x3]  ;;  %v4503_v46 = vpop.f32.mrf.mxu1 }
 0x168   : > { %v4460_v6 = vpop.f32.mrf.mxu0  ;;  %v4486_v52 = vrot.slane %v596_v0, %v4472_v58  ;;  %5255 = vst [vmem:[#allocation37_spill] sm:$0xff] %v4503_v46 }
 0x169   : > { %5240 = vst [vmem:[#allocation22_spill] sm:$0xff] %v4460_v6  ;;  %v4479_v6 = vsub.s32 1, %v599_v7  ;;  %v4509_v43 = vpop.f32.mrf.mxu1 }
 0x16a   : > { %v4464_v51 = vpop.f32.mrf.mxu0  ;;  %v1043_v7 = vadd.f32 %v4295_v60, %v4486_v52  ;;  %v1053_v60 = vadd.f32 %v4323_v8, %v4486_v52  ;;  %v1057_v8 = vadd.f32 %v4334_v12, %v4486_v52  ;;  %v1063_v12 = vadd.f32 %v4340_v15, %v4486_v52 }
 0x16b   : > { %5242 = vst [vmem:[#allocation24_spill] sm:$0xff] %v4464_v51  ;;  %5248 = vst [vmem:[#allocation30_spill] sm:$0xff] %v4479_v6 }
 0x16c   : > { %v4466_v49 = vpop.f32.mrf.mxu0 }
 0x16d   : > { %5243 = vst [vmem:[#allocation25_spill] sm:$0xff] %v4466_v49 }
 0x16e   : > { %v4470_v48 = vpop.f32.mrf.mxu0 }
 0x16f   : > { %5245 = vst [vmem:[#allocation27_spill] sm:$0xff] %v4470_v48  ;;  %v4491_v48 = vrot.slane %v596_v0, %v4479_v6 }
 0x170   : > { %v4477_v54 = vpop.f32.mrf.mxu0 }
 0x171   : > { %5247 = vst [vmem:[#allocation29_spill] sm:$0xff] %v4477_v54 }
 0x172   : > { %v4483_v51 = vpop.f32.mrf.mxu0 }
 0x173   : > { %5250 = vst [vmem:[#allocation32_spill] sm:$0xff] %v4483_v51  ;;  %v1045_v51 = vadd.f32 %v4302_v62, %v4491_v48  ;;  %v1049_v62 = vadd.f32 %v4316_v4, %v4491_v48 }
 0x174   : > { %v4488_v49 = vpop.f32.mrf.mxu0 }
 0x175   : > { %5251 = vst [vmem:[#allocation33_spill] sm:$0xff] %v4488_v49  ;;  %v1216_v49 = vadd.f32 %v4304_v63, %v1043_v7  ;;  %v1218_v6 = vadd.f32 %v4311_v2, %v1045_v51  ;;  %v1047_v2 = vadd.f32 %v4309_v1, %v4486_v52  ;;  %v1226_v7 = vadd.f32 %v4336_v13, %v1053_v60 }
 0x176   : > { %v4495_v55 = vpop.f32.mrf.mxu0  ;;  %v1222_v4 = vadd.f32 %v4330_v10, %v1049_v62  ;;  %v1230_v13 = vadd.f32 %v4353_v20, %v1057_v8  ;;  %v1065_v10 = vadd.f32 %v4349_v18, %v4491_v48  ;;  %v1236_v20 = vadd.f32 %v4366_v26, %v1063_v12 }
 0x177   : > { %5253 = vst [vmem:[#allocation35_spill] sm:$0xff] %v4495_v55  ;;  %v1220_v1 = vadd.f32 %v4318_v5, %v1047_v2  ;;  %v1069_v12 = vadd.f32 %v4355_v21, %v4491_v48 }
 0x178   : > { %v4499_v54 = vpop.f32.mrf.mxu0 }
 0x179   : > { %5254 = vst [vmem:[#allocation36_spill] sm:$0xff] %v4499_v54 }
 0x17a   : > { %v4505_v58 = vpop.f32.mrf.mxu0 }
 0x17b   : > { %5256 = vst [vmem:[#allocation38_spill] sm:$0xff] %v4505_v58  ;;  %v1055_v58 = vadd.f32 %v4332_v11, %v4491_v48  ;;  %v1059_v11 = vadd.f32 %v4338_v14, %v4491_v48 }
 0x17c   : > { %v1388_v0 = vpop.f32.mrf.mxu0 }
 0x17d   : > { %v1389_v45 = vadd.f32 %v1388_v0, %v1216_v49  ;;  %v4519_v49 = vpop.f32.mrf.mxu1  ;;  %v1228_v0 = vadd.f32 %v4347_v17, %v1055_v58  ;;  %v1232_v14 = vadd.f32 %v4360_v23, %v1059_v11 }
 0x17e   : > { %v1390_v55 = vpop.f32.mrf.mxu0  ;;  %5257 = vst [vmem:[#allocation39_spill] sm:$0xff] %v4519_v49 }
 0x17f   : > { %v1391_v54 = vadd.f32 %v1390_v55, %v1218_v6  ;;  %v1527_v46 = vmax.f32 %v1389_v45, 0.0 }
 0x180   : > { %v1392_v9 = vpop.f32.mrf.mxu0 }
 0x181   : > { %v1528_v63 = vmax.f32 %v1391_v54, 0.0  ;;  %v4529_v54 = vpop.f32.mrf.mxu1  ;;  %v1393_v17 = vadd.f32 %v1392_v9, %v1220_v1 }
 0x182   : > { %v1394_v51 = vpop.f32.mrf.mxu0 }
 0x183   : > { %v1583_v55 = vmax.f32 %v1527_v46, %v1528_v63  ;;  %v1395_v46 = vadd.f32 %v1394_v51, %v1222_v4  ;;  %v4537_v2 = vpop.f32.mrf.mxu1  ;;  %v1529_v51 = vmax.f32 %v1393_v17, 0.0 }
 0x184   : > { %v1398_v6 = vpop.f32.mrf.mxu0 }
 0x185   : > { %v1399_v45 = vadd.f32 %v1398_v6, %v1226_v7  ;;  %v1530_v8 = vmax.f32 %v1395_v46, 0.0  ;;  %v4541_v23 = vpop.f32.mrf.mxu1 }
 0x186   : > { %v1400_v49 = vpop.f32.mrf.mxu0 }
 0x187   : > { %v1401_v60 = vadd.f32 %v1400_v49, %v1228_v0  ;;  %v1531_v62 = vmax.f32 %v1399_v45, 0.0  ;;  %v1238_v49 = vadd.f32 %v4372_v29, %v1065_v10  ;;  %v1073_v45 = vadd.f32 %v4357_v22, %v4486_v52 }
 0x188   : > { %v1402_v58 = vpop.f32.mrf.mxu0  ;;  %v1075_v29 = vadd.f32 %v4362_v24, %v4491_v48  ;;  %v3606_v24 = vld [vmem:[%s5205_s3 + $0x170] ss:$8 sps:$4 sm:$0xff]  }
 0x189   : > { %v1532_v63 = vmax.f32 %v1401_v60, 0.0  ;;  %v1403_v5 = vadd.f32 %v1402_v58, %v1230_v13  ;;  %v1584_v13 = vmax.f32 %v1529_v51, %v1530_v8  ;;  %v1067_v58 = vadd.f32 %v4351_v19, %v4486_v52  ;;  %v3611_v19 = vld [vmem:[%s5205_s3 + $0x164] ss:$8 sps:$4 sm:$0xff]  }
 0x18a   : > { %v1404_v7 = vpop.f32.mrf.mxu0  ;;  %v1246_v22 = vadd.f32 %v4390_v38, %v1073_v45  ;;  %v1248_v38 = vadd.f32 %v4396_v41, %v1075_v29  ;;  %v3775_v51 = vmov 0.0|0.0  }
 0x18b   : > { %v1585_v6 = vmax.f32 %v1531_v62, %v1532_v63  ;;  %v1405_v15 = vadd.f32 %v1404_v7, %v1232_v14  ;;  %v1533_v9 = vmax.f32 %v1403_v5, 0.0  ;;  %v4551_v14 = vpop.f32.mrf.mxu1  ;;  %v1077_v63 = vadd.f32 %v4364_v25, %v4486_v52 }
 0x18c   : > { %v1408_v4 = vpop.f32.mrf.mxu0  ;;  %v1079_v25 = vadd.f32 %v4368_v27, %v4491_v48  ;;  %v3609_v27 = vld [vmem:[%s5205_s3 + $0x160] ss:$8 sps:$4 sm:$0xff]  }
 0x18d   : > { %v1611_v18 = vmax.f32 %v1583_v55, %v1585_v6  ;;  %v1534_v0 = vmax.f32 %v1405_v15, 0.0  ;;  %v1409_v1 = vadd.f32 %v1408_v4, %v1236_v20  ;;  %v1242_v20 = vadd.f32 %v4384_v35, %v1069_v12  ;;  %v4572_v15 = vpop.f32.mrf.mxu1 }
 0x18e   : > { %v1410_v11 = vpop.f32.mrf.mxu0  ;;  %v1240_v6 = vadd.f32 %v4378_v32, %v1067_v58  ;;  %v1250_v4 = vadd.f32 %v4402_v44, %v1077_v63  ;;  %v1083_v35 = vadd.f32 %v4370_v28, %v4486_v52  ;;  %v1085_v32 = vadd.f32 %v4374_v30, %v4491_v48  ;;  %v3614_v44 = vld [vmem:[%s5205_s3 + $0x154] ss:$8 sps:$4 sm:$0xff]  }
 0x18f   : > { %v1586_v60 = vmax.f32 %v1533_v9, %v1534_v0  ;;  %v1411_v26 = vadd.f32 %v1410_v11, %v1238_v49  ;;  %v1535_v10 = vmax.f32 %v1409_v1, 0.0  ;;  %v1252_v1 = vadd.f32 %v4408_v47, %v1079_v25 }
 0x190   : > { %v1412_v46 = vpop.f32.mrf.mxu0 }
 0x191   : > { %v1612_v55 = vmax.f32 %v1584_v13, %v1586_v60  ;;  %v1536_v17 = vmax.f32 %v1411_v26, 0.0  ;;  %v1413_v9 = vadd.f32 %v1412_v46, %v1240_v6  ;;  %v4587_v13 = vpop.f32.mrf.mxu1  ;;  %v1256_v26 = vadd.f32 %v4414_v50, %v1083_v35  ;;  %v3612_v46 = vld [vmem:[%s5205_s3 + $0x150] ss:$8 sps:$4 sm:$0xff]  }
 0x192   : > { %v1414_v62 = vpop.f32.mrf.mxu0  ;;  %v1087_v35 = vadd.f32 %v4376_v31, %v4486_v52  ;;  %v3623_v31 = vld [vmem:[%s5205_s3 + $0x124] ss:$8 sps:$4 sm:$0xff]  }
 0x193   : > { %v4556_v5 = vmax.f32 %v1535_v10, %v1536_v17  ;;  %v4558_v21 = vpack.c.bf16 %v1612_v55, %v1611_v18  ;;  %v1415_v41 = vadd.f32 %v1414_v62, %v1242_v20  ;;  %v1258_v55 = vadd.f32 %v4420_v53, %v1085_v32  ;;  %v3617_v17 = vld [vmem:[%s5205_s3 + $0x144] ss:$8 sps:$4 sm:$0xff]   ;;  %v4598_v63 = vpop.f32.mrf.mxu1 }
 0x194   : > { %v1418_v7 = vpop.f32.mrf.mxu0  ;;  %v1537_v10 = vmax.f32 %v1413_v9, 0.0 }
 0x195   : > { %v1419_v8 = vadd.f32 %v1418_v7, %v1246_v22  ;;  %2157 = vmatprep.mubr.bf16.mxu1 %v4558_v21  ;;  %v1538_v12 = vmax.f32 %v1415_v41, 0.0  ;;  %v1093_v7 = vadd.f32 %v4382_v34, %v4486_v52  ;;  %v1095_v34 = vadd.f32 %v4386_v36, %v4491_v48  ;;  %v4614_v41 = vpop.f32.mrf.mxu1  ;;  %v3618_v36 = vld [vmem:[%s5205_s3 + $0x130] ss:$8 sps:$4 sm:$0xff]  }
 0x196   : > { %v1420_v49 = vpop.f32.mrf.mxu0  ;;  %2158 = vmatmul.mubr.bf16.vlgmr.msra.gmra.mxu1 %v3775_v51 }
 0x197   : > { %v1421_v18 = vadd.f32 %v1420_v49, %v1248_v38  ;;  %2205 = vmatpush1.bf16.msra.mxu1 %v3606_v24  ;;  %v1539_v28 = vmax.f32 %v1419_v8, 0.0  ;;  %v3615_v38 = vld [vmem:[%s5205_s3 + $0x140] ss:$8 sps:$4 sm:$0xff]   ;;  %v3620_v8 = vld [vmem:[%s5205_s3 + $0x134] ss:$8 sps:$4 sm:$0xff]  }
 0x198   : > { %v1422_v0 = vpop.f32.mrf.mxu0  ;;  %2206 = vmatprep.subr.bf16.mxu1 %v3611_v19  ;;  %v1588_v19 = vmax.f32 %v1537_v10, %v1538_v12 }
 0x199   : > { %v1540_v11 = vmax.f32 %v1421_v18, 0.0  ;;  %v1423_v45 = vadd.f32 %v1422_v0, %v1250_v4 }
 0x19a   : > { %v1424_v60 = vpop.f32.mrf.mxu0 }
 0x19b   : > { %v1589_v29 = vmax.f32 %v1539_v28, %v1540_v11  ;;  %v1425_v30 = vadd.f32 %v1424_v60, %v1252_v1  ;;  %2207 = vmatpush1.bf16.msra.mxu1 %v3609_v27  ;;  %v1541_v50 = vmax.f32 %v1423_v45, 0.0  ;;  %v1097_v27 = vadd.f32 %v4388_v37, %v4486_v52  ;;  %v4637_v45 = vpop.f32.mrf.mxu1 }
 0x19c   : > { %v1428_v47 = vpop.f32.mrf.mxu0  ;;  %2208 = vmatprep.subr.bf16.mxu1 %v3614_v44  ;;  %v1268_v44 = vadd.f32 %v4444_v16, %v1095_v34  ;;  %v1099_v37 = vadd.f32 %v4392_v39, %v4491_v48  ;;  %v1260_v28 = vadd.f32 %v4426_v56, %v1087_v35  ;;  %v1103_v11 = vadd.f32 %v4394_v40, %v4486_v52  ;;  %v3621_v39 = vld [vmem:[%s5205_s3 + $0x120] ss:$8 sps:$4 sm:$0xff]   ;;  %v3626_v40 = vld [vmem:[%s5205_s3 + $0x114] ss:$8 sps:$4 sm:$0xff]  }
 0x19d   : > { %v1613_v58 = vmax.f32 %v4556_v5, %v1589_v29  ;;  %v1542_v62 = vmax.f32 %v1425_v30, 0.0  ;;  %v1429_v22 = vadd.f32 %v1428_v47, %v1256_v26  ;;  %v1089_v5 = vadd.f32 %v4380_v33, %v4491_v48  ;;  %v4651_v47 = vpop.f32.mrf.mxu1 }
 0x19e   : > { %v1430_v24 = vpop.f32.mrf.mxu0  ;;  %v1266_v33 = vadd.f32 %v4438_v3, %v1093_v7  ;;  %v1105_v56 = vadd.f32 %v4398_v42, %v4491_v48 }
 0x19f   : > { %v1590_v53 = vmax.f32 %v1541_v50, %v1542_v62  ;;  %v1431_v20 = vadd.f32 %v1430_v24, %v1258_v55  ;;  %2209 = vmatpush1.bf16.msra.mxu1 %v3612_v46  ;;  %v1543_v49 = vmax.f32 %v1429_v22, 0.0  ;;  %v1262_v3 = vadd.f32 %v4432_v59, %v1089_v5  ;;  %v5258_v55 = vld [vmem:[#allocation23_spill] sm:$0xff]  ;;  %v3624_v24 = vld [vmem:[%s5205_s3 + $0x110] ss:$8 sps:$4 sm:$0xff]   ;;  %v4667_v35 = vpop.f32.mrf.mxu1 }
 0x1a0   : > { %v1432_v25 = vpop.f32.mrf.mxu0  ;;  %2210 = vmatprep.subr.bf16.mxu1 %v3617_v17  ;;  %v1270_v59 = vadd.f32 %v4450_v57, %v1097_v27  ;;  %v1276_v10 = vadd.f32 %v5258_v55, %v1103_v11  ;;  %v3629_v5 = vld [vmem:[%s5205_s3 + $0x104] ss:$8 sps:$4 sm:$0xff]   ;;  %v3632_v11 = vld [vmem:[%s5205_s3 + $0x1f4] ss:$8 sps:$4 sm:$0xff]   ;;  %v3630_v55 = vld [vmem:[%s5205_s3 + $0x1f0] ss:$8 sps:$4 sm:$0xff]  }
 0x1a1   : > { %v1614_v6 = vmax.f32 %v1588_v19, %v1590_v53  ;;  %v1544_v4 = vmax.f32 %v1431_v20, 0.0  ;;  %v1433_v12 = vadd.f32 %v1432_v25, %v1260_v28  ;;  %v5261_v19 = vld [vmem:[#allocation3_spill] sm:$0xff] }
 0x1a2   : > { %v1434_v18 = vpop.f32.mrf.mxu0  ;;  %v1109_v53 = vadd.f32 %v5261_v19, %v4491_v48 }
 0x1a3   : > { %v4619_v32 = vmax.f32 %v1543_v49, %v1544_v4  ;;  %v4621_v9 = vpack.c.bf16 %v1614_v6, %v1613_v58  ;;  %2211 = vmatpush1.bf16.msra.mxu1 %v3615_v38  ;;  %v1435_v26 = vadd.f32 %v1434_v18, %v1262_v3  ;;  %v5259_v58 = vld [vmem:[#allocation2_spill] sm:$0xff]  ;;  %v1545_v20 = vmax.f32 %v1433_v12, 0.0  ;;  %v5262_v49 = vld [vmem:[#allocation4_spill] sm:$0xff]  ;;  %v4680_v12 = vpop.f32.mrf.mxu1 }
 0x1a4   : > { %v1438_v0 = vpop.f32.mrf.mxu0  ;;  %2212 = vmatprep.subr.bf16.mxu1 %v3620_v8  ;;  %v1107_v42 = vadd.f32 %v5259_v58, %v4486_v52  ;;  %v1113_v4 = vadd.f32 %v5262_v49, %v4486_v52  ;;  %v3627_v3 = vld [vmem:[%s5205_s3 + $0x100] ss:$8 sps:$4 sm:$0xff]   ;;  %v3635_v58 = vld [vmem:[%s5205_s3 + $0x1e4] ss:$8 sps:$4 sm:$0xff]   ;;  %v3638_v49 = vld [vmem:[%s5205_s3 + $0x1d4] ss:$8 sps:$4 sm:$0xff]  }
 0x1a5   : > { %v1439_v1 = vadd.f32 %v1438_v0, %v1266_v33  ;;  %2167 = vmatprep.mubr.bf16.mxu1 %v4621_v9  ;;  %v1546_v50 = vmax.f32 %v1435_v26, 0.0  ;;  %v5263_v33 = vld [vmem:[#allocation31_spill] sm:$0xff] }
 0x1a6   : > { %v1440_v60 = vpop.f32.mrf.mxu0  ;;  %2168 = vmatmul.mubr.bf16.gmra.mxu1 %v4558_v21  ;;  %v1272_v21 = vadd.f32 %v4456_v61, %v1099_v37  ;;  %v5260_v61 = vld [vmem:[#allocation26_spill] sm:$0xff]  ;;  %v1280_v27 = vadd.f32 %v5263_v33, %v1107_v42  ;;  %v5265_v37 = vld [vmem:[#allocation5_spill] sm:$0xff]  ;;  %v5268_v42 = vld [vmem:[#allocation7_spill] sm:$0xff] }
 0x1a7   : > { %v1441_v16 = vadd.f32 %v1440_v60, %v1268_v44  ;;  %2213 = vmatpush1.bf16.msra.mxu1 %v3618_v36  ;;  %v1547_v57 = vmax.f32 %v1439_v1, 0.0  ;;  %v1278_v7 = vadd.f32 %v5260_v61, %v1105_v56  ;;  %v1592_v36 = vmax.f32 %v1545_v20, %v1546_v50  ;;  %v4698_v61 = vpop.f32.mrf.mxu1 }
 0x1a8   : > { %v1442_v29 = vpop.f32.mrf.mxu0  ;;  %2214 = vmatprep.subr.bf16.mxu1 %v3623_v31  ;;  %v1115_v1 = vadd.f32 %v5265_v37, %v4491_v48  ;;  %v1119_v50 = vadd.f32 %v5268_v42, %v4491_v48 }
 0x1a9   : > { %v1548_v30 = vmax.f32 %v1441_v16, 0.0  ;;  %v1443_v46 = vadd.f32 %v1442_v29, %v1270_v59 }
 0x1aa   : > { %v1444_v17 = vpop.f32.mrf.mxu0 }
 0x1ab   : > { %v1593_v62 = vmax.f32 %v1547_v57, %v1548_v30  ;;  %v1445_v22 = vadd.f32 %v1444_v17, %v1272_v21  ;;  %2215 = vmatpush1.bf16.msra.mxu1 %v3621_v39  ;;  %v1549_v8 = vmax.f32 %v1443_v46, 0.0  ;;  %v5266_v39 = vld [vmem:[#allocation37_spill] sm:$0xff] }
 0x1ac   : > { %v1448_v38 = vpop.f32.mrf.mxu0  ;;  %2216 = vmatprep.subr.bf16.mxu1 %v3626_v40  ;;  %v1286_v56 = vadd.f32 %v5266_v39, %v1113_v4  ;;  %v5267_v40 = vld [vmem:[#allocation6_spill] sm:$0xff]  ;;  %v1292_v4 = vadd.f32 %v4529_v54, %v1119_v50  ;;  %v3644_v50 = vld [vmem:[%s5205_s3 + $0x1b4] ss:$8 sps:$4 sm:$0xff]  }
 0x1ad   : > { %v1615_v25 = vmax.f32 %v4619_v32, %v1593_v62  ;;  %v1550_v34 = vmax.f32 %v1445_v22, 0.0  ;;  %v1449_v6 = vadd.f32 %v1448_v38, %v1276_v10  ;;  %v5264_v32 = vld [vmem:[#allocation34_spill] sm:$0xff]  ;;  %v1117_v21 = vadd.f32 %v5267_v40, %v4486_v52 }
 0x1ae   : > { %v1450_v18 = vpop.f32.mrf.mxu0  ;;  %v1282_v44 = vadd.f32 %v5264_v32, %v1109_v53  ;;  %v1288_v10 = vadd.f32 %v4509_v43, %v1115_v1  ;;  %v5269_v43 = vld [vmem:[#allocation39_spill] sm:$0xff]  ;;  %v5270_v53 = vld [vmem:[#allocation8_spill] sm:$0xff] }
 0x1af   : > { %v1594_v0 = vmax.f32 %v1549_v8, %v1550_v34  ;;  %v1451_v31 = vadd.f32 %v1450_v18, %v1278_v7  ;;  %2217 = vmatpush1.bf16.msra.mxu1 %v3624_v24  ;;  %v1551_v59 = vmax.f32 %v1449_v6, 0.0  ;;  %v1290_v19 = vadd.f32 %v5269_v43, %v1117_v21  ;;  %v5271_v8 = vld [vmem:[#allocation9_spill] sm:$0xff] }
 0x1b0   : > { %v1452_v28 = vpop.f32.mrf.mxu0  ;;  %2218 = vmatprep.subr.bf16.mxu1 %v3629_v5  ;;  %v1123_v20 = vadd.f32 %v5270_v53, %v4486_v52  ;;  %v1125_v34 = vadd.f32 %v5271_v8, %v4491_v48  ;;  %v3636_v1 = vld [vmem:[%s5205_s3 + $0x1d0] ss:$8 sps:$4 sm:$0xff]  }
 0x1b1   : > { %v1616_v60 = vmax.f32 %v1592_v36, %v1594_v0  ;;  %v1552_v26 = vmax.f32 %v1451_v31, 0.0  ;;  %v1453_v16 = vadd.f32 %v1452_v28, %v1280_v27  ;;  %v4713_v36 = vpop.f32.mrf.mxu1  ;;  %v5273_v28 = vld [vmem:[#allocation11_spill] sm:$0xff] }
 0x1b2   : > { %v1454_v29 = vpop.f32.mrf.mxu0  ;;  %v1296_v31 = vadd.f32 %v4537_v2, %v1123_v20  ;;  %v1298_v54 = vadd.f32 %v4541_v23, %v1125_v34  ;;  %v3641_v2 = vld [vmem:[%s5205_s3 + $0x1c4] ss:$8 sps:$4 sm:$0xff]  }
 0x1b3   : > { %v4684_v57 = vpack.c.bf16 %v1616_v60, %v1615_v25  ;;  %v4686_v30 = vmax.f32 %v1551_v59, %v1552_v26  ;;  %v1455_v46 = vadd.f32 %v1454_v29, %v1282_v44  ;;  %2219 = vmatpush1.bf16.msra.mxu1 %v3627_v3  ;;  %v1553_v62 = vmax.f32 %v1453_v16, 0.0  ;;  %v3633_v25 = vld [vmem:[%s5205_s3 + $0x1e0] ss:$8 sps:$4 sm:$0xff]   ;;  %v4730_v40 = vpop.f32.mrf.mxu1 }
 0x1b4   : > { %v1458_v17 = vpop.f32.mrf.mxu0  ;;  %2220 = vmatprep.subr.bf16.mxu1 %v3632_v11  ;;  %v5272_v3 = vld [vmem:[#allocation10_spill] sm:$0xff]  ;;  %v1129_v11 = vadd.f32 %v5273_v28, %v4491_v48 }
 0x1b5   : > { %v1554_v22 = vmax.f32 %v1455_v46, 0.0  ;;  %v1459_v24 = vadd.f32 %v1458_v17, %v1286_v56  ;;  %2177 = vmatprep.mubr.bf16.mxu1 %v4684_v57  ;;  %v1127_v32 = vadd.f32 %v5272_v3, %v4486_v52  ;;  %v5274_v56 = vld [vmem:[#allocation12_spill] sm:$0xff]  ;;  %v5275_v17 = vld [vmem:[#allocation13_spill] sm:$0xff]  ;;  %v4743_v43 = vpop.f32.mrf.mxu1 }
 0x1b6   : > { %v1460_v7 = vpop.f32.mrf.mxu0  ;;  %2178 = vmatmul.mubr.bf16.gmra.mxu1 %v4621_v9  ;;  %v1133_v29 = vadd.f32 %v5274_v56, %v4486_v52  ;;  %v5280_v56 = vld [vmem:[#allocation18_spill] sm:$0xff] }
 0x1b7   : > { %v1596_v38 = vmax.f32 %v1553_v62, %v1554_v22  ;;  %v1461_v5 = vadd.f32 %v1460_v7, %v1288_v10  ;;  %2221 = vmatpush2.bf16.msra.mxu1 %v3630_v55  ;;  %v1555_v18 = vmax.f32 %v1459_v24, 0.0  ;;  %v1300_v21 = vadd.f32 %v4551_v14, %v1127_v32  ;;  %v3639_v10 = vld [vmem:[%s5205_s3 + $0x1c0] ss:$8 sps:$4 sm:$0xff]  }
 0x1b8   : > { %v1462_v6 = vpop.f32.mrf.mxu0  ;;  %2222 = vmatprep.subr.bf16.mxu1 %v3635_v58  ;;  %v1135_v58 = vadd.f32 %v5275_v17, %v4491_v48  ;;  %v1306_v7 = vadd.f32 %v4587_v13, %v1133_v29  ;;  %v3647_v13 = vld [vmem:[%s5205_s3 + $0x1a4] ss:$8 sps:$4 sm:$0xff]   ;;  %v1147_v29 = vadd.f32 %v5280_v56, %v4486_v52 }
 0x1b9   : > { %v1556_v33 = vmax.f32 %v1461_v5, 0.0  ;;  %v1463_v27 = vadd.f32 %v1462_v6, %v1290_v19  ;;  %v5277_v6 = vld [vmem:[#allocation15_spill] sm:$0xff] }
 0x1ba   : > { %v1464_v0 = vpop.f32.mrf.mxu0  ;;  %v1308_v8 = vadd.f32 %v4598_v63, %v1135_v58 }
 0x1bb   : > { %v1597_v44 = vmax.f32 %v1555_v18, %v1556_v33  ;;  %v1465_v37 = vadd.f32 %v1464_v0, %v1292_v4  ;;  %2223 = vmatpush2.bf16.msra.mxu1 %v3633_v25  ;;  %v1557_v26 = vmax.f32 %v1463_v27, 0.0  ;;  %v4761_v27 = vpop.f32.mrf.mxu1 }
 0x1bc   : > { %v1468_v60 = vpop.f32.mrf.mxu0  ;;  %2224 = vmatprep.subr.bf16.mxu1 %v3638_v49  ;;  %v1139_v49 = vadd.f32 %v5277_v6, %v4491_v48 }
 0x1bd   : > { %v1617_v59 = vmax.f32 %v4686_v30, %v1597_v44  ;;  %v1558_v16 = vmax.f32 %v1465_v37, 0.0  ;;  %v1469_v39 = vadd.f32 %v1468_v60, %v1296_v31  ;;  %v1302_v30 = vadd.f32 %v4572_v15, %v1129_v11  ;;  %v5276_v15 = vld [vmem:[#allocation14_spill] sm:$0xff]  ;;  %v5278_v31 = vld [vmem:[#allocation16_spill] sm:$0xff] }
 0x1be   : > { %v1470_v23 = vpop.f32.mrf.mxu0  ;;  %v1137_v53 = vadd.f32 %v5276_v15, %v4486_v52  ;;  %v1143_v3 = vadd.f32 %v5278_v31, %v4486_v52  ;;  %v3645_v37 = vld [vmem:[%s5205_s3 + $0x1a0] ss:$8 sps:$4 sm:$0xff]   ;;  %v3650_v11 = vld [vmem:[%s5205_s3 + $0x194] ss:$8 sps:$4 sm:$0xff]  }
 0x1bf   : > { %v1598_v46 = vmax.f32 %v1557_v26, %v1558_v16  ;;  %v1471_v55 = vadd.f32 %v1470_v23, %v1298_v54  ;;  %2225 = vmatpush2.bf16.msra.mxu1 %v3636_v1  ;;  %v1559_v14 = vmax.f32 %v1469_v39, 0.0  ;;  %v5279_v1 = vld [vmem:[#allocation17_spill] sm:$0xff]  ;;  %v4776_v26 = vpop.f32.mrf.mxu1  ;;  %v3651_v15 = vld [vmem:[%s5205_s3 + $0x180] ss:$8 sps:$4 sm:$0xff]  }
 0x1c0   : > { %v1472_v42 = vpop.f32.mrf.mxu0  ;;  %2226 = vmatprep.subr.bf16.mxu1 %v3641_v2  ;;  %v1310_v63 = vadd.f32 %v4614_v41, %v1137_v53  ;;  %v1145_v54 = vadd.f32 %v5279_v1, %v4491_v48  ;;  %v1312_v41 = vadd.f32 %v4637_v45, %v1139_v49  ;;  %v1316_v39 = vadd.f32 %v4651_v47, %v1143_v3  ;;  %v3653_v47 = vld [vmem:[%s5205_s3 + $0x184] ss:$8 sps:$4 sm:$0xff]  }
 0x1c1   : > { %v1618_v62 = vmax.f32 %v1596_v38, %v1598_v46  ;;  %v1560_v22 = vmax.f32 %v1471_v55, 0.0  ;;  %v1473_v24 = vadd.f32 %v1472_v42, %v1300_v21  ;;  %v3642_v38 = vld [vmem:[%s5205_s3 + $0x1b0] ss:$8 sps:$4 sm:$0xff]   ;;  %v5281_v55 = vld [vmem:[#allocation19_spill] sm:$0xff] }
 0x1c2   : > { %v1474_v19 = vpop.f32.mrf.mxu0  ;;  %v3648_v46 = vld [vmem:[%s5205_s3 + $0x190] ss:$8 sps:$4 sm:$0xff]   ;;  %v1318_v45 = vadd.f32 %v4667_v35, %v1145_v54  ;;  %v1320_v35 = vadd.f32 %v4680_v12, %v1147_v29 }
 0x1c3   : > { %v4747_v20 = vpack.c.bf16 %v1618_v62, %v1617_v59  ;;  %v4749_v5 = vmax.f32 %v1559_v14, %v1560_v22  ;;  %v1475_v25 = vadd.f32 %v1474_v19, %v1302_v30  ;;  %2227 = vmatpush2.bf16.msra.mxu1 %v3639_v10  ;;  %v1561_v4 = vmax.f32 %v1473_v24, 0.0  ;;  %v5282_v62 = vld [vmem:[#allocation20_spill] sm:$0xff]  ;;  %v1337_v22 = vpop.f32.mrf.mxu1 }
 0x1c4   : > { %v1478_v34 = vpop.f32.mrf.mxu0  ;;  %2228 = vmatprep.subr.bf16.mxu1 %v3644_v50  ;;  %v1149_v10 = vadd.f32 %v5281_v55, %v4491_v48  ;;  %v1153_v14 = vadd.f32 %v5282_v62, %v4486_v52 }
 0x1c5   : > { %v1562_v18 = vmax.f32 %v1475_v25, 0.0  ;;  %v1479_v33 = vadd.f32 %v1478_v34, %v1306_v7  ;;  %2187 = vmatprep.mubr.bf16.mxu1 %v4747_v20 }
 0x1c6   : > { %v1480_v0 = vpop.f32.mrf.mxu0  ;;  %2188 = vmatmul.mubr.bf16.gmra.mxu1 %v4684_v57  ;;  %v1322_v53 = vadd.f32 %v4698_v61, %v1149_v10  ;;  %v1326_v49 = vadd.f32 %v4713_v36, %v1153_v14  ;;  %v5288_v10 = vld [vmem:[#allocation29_spill] sm:$0xff]  ;;  %v3659_v14 = vld [vmem:[%s5205_s3 + $0x264] ss:$8 sps:$4 sm:$0xff]  }
 0x1c7   : > { %v1600_v32 = vmax.f32 %v1561_v4, %v1562_v18  ;;  %v1481_v44 = vadd.f32 %v1480_v0, %v1308_v8  ;;  %2229 = vmatpush2.bf16.msra.mxu1 %v3642_v38  ;;  %v1563_v60 = vmax.f32 %v1479_v33, 0.0  ;;  %v3656_v8 = vld [vmem:[%s5205_s3 + $0x274] ss:$8 sps:$4 sm:$0xff]   ;;  %v1339_v4 = vpop.f32.mrf.mxu1  ;;  %v5284_v33 = vld [vmem:[#allocation22_spill] sm:$0xff] }
 0x1c8   : > { %v1482_v28 = vpop.f32.mrf.mxu0  ;;  %2230 = vmatprep.subr.bf16.mxu1 %v3647_v13  ;;  %v1157_v61 = vadd.f32 %v5284_v33, %v4486_v52 }
 0x1c9   : > { %v1564_v2 = vmax.f32 %v1481_v44, 0.0  ;;  %v1483_v59 = vadd.f32 %v1482_v28, %v1310_v63  ;;  %v1341_v28 = vpop.f32.mrf.mxu1 }
 0x1ca   : > { %v1484_v16 = vpop.f32.mrf.mxu0 }
 0x1cb   : > { %v1601_v23 = vmax.f32 %v1563_v60, %v1564_v2  ;;  %v1485_v21 = vadd.f32 %v1484_v16, %v1312_v41  ;;  %2231 = vmatpush2.bf16.msra.mxu1 %v3645_v37  ;;  %v1565_v58 = vmax.f32 %v1483_v59, 0.0  ;;  %v1330_v41 = vadd.f32 %v4743_v43, %v1157_v61  ;;  %v5286_v60 = vld [vmem:[#allocation25_spill] sm:$0xff]  ;;  %v5287_v16 = vld [vmem:[#allocation27_spill] sm:$0xff] }
 0x1cc   : > { %v1488_v30 = vpop.f32.mrf.mxu0  ;;  %2232 = vmatprep.subr.bf16.mxu1 %v3650_v11  ;;  %v1163_v2 = vadd.f32 %v5286_v60, %v4486_v52 }
 0x1cd   : > { %v1619_v17 = vmax.f32 %v4749_v5, %v1601_v23  ;;  %v1566_v42 = vmax.f32 %v1485_v21, 0.0  ;;  %v1489_v50 = vadd.f32 %v1488_v30, %v1316_v39  ;;  %v5283_v5 = vld [vmem:[#allocation21_spill] sm:$0xff]  ;;  %v1165_v39 = vadd.f32 %v5287_v16, %v4491_v48 }
 0x1ce   : > { %v1490_v24 = vpop.f32.mrf.mxu0  ;;  %v1155_v25 = vadd.f32 %v5283_v5, %v4491_v48  ;;  %v1336_v43 = vadd.f32 %v4776_v26, %v1163_v2  ;;  %v1167_v30 = vadd.f32 %v5288_v10, %v4486_v52 }
 0x1cf   : > { %v1602_v7 = vmax.f32 %v1565_v58, %v1566_v42  ;;  %v1491_v19 = vadd.f32 %v1490_v24, %v1318_v45  ;;  %2233 = vmatpush2.bf16.msra.mxu1 %v3648_v46  ;;  %v1567_v12 = vmax.f32 %v1489_v50, 0.0  ;;  %v1345_v45 = vpop.f32.mrf.mxu1  ;;  %v3654_v58 = vld [vmem:[%s5205_s3 + $0x270] ss:$8 sps:$4 sm:$0xff]   ;;  %v1338_v42 = vadd.f32 %v1337_v22, %v1165_v39 }
 0x1d0   : > { %v1492_v38 = vpop.f32.mrf.mxu0  ;;  %2234 = vmatprep.subr.bf16.mxu1 %v3653_v47  ;;  %v1328_v3 = vadd.f32 %v4730_v40, %v1155_v25  ;;  %v5289_v50 = vld [vmem:[#allocation32_spill] sm:$0xff]  ;;  %v1340_v22 = vadd.f32 %v1339_v4, %v1167_v30 }
 0x1d1   : > { %v1620_v34 = vmax.f32 %v1600_v32, %v1602_v7  ;;  %v1568_v13 = vmax.f32 %v1491_v19, 0.0  ;;  %v1493_v6 = vadd.f32 %v1492_v38, %v1320_v35  ;;  %v5285_v32 = vld [vmem:[#allocation24_spill] sm:$0xff]  ;;  %v5290_v19 = vld [vmem:[#allocation33_spill] sm:$0xff] }
 0x1d2   : > { %v1494_v18 = vpop.f32.mrf.mxu0  ;;  %v1159_v37 = vadd.f32 %v5285_v32, %v4491_v48 }
 0x1d3   : > { %v4806_v0 = vpack.c.bf16 %v1620_v34, %v1619_v17  ;;  %v4808_v63 = vmax.f32 %v1567_v12, %v1568_v13  ;;  %v1495_v31 = vadd.f32 %v1494_v18, %v1322_v53  ;;  %2235 = vmatpush2.bf16.msra.mxu1 %v3651_v15  ;;  %v1569_v1 = vmax.f32 %v1493_v6, 0.0  ;;  %v1347_v53 = vpop.f32.mrf.mxu1  ;;  %v5291_v12 = vld [vmem:[#allocation35_spill] sm:$0xff] }
 0x1d4   : > { %v1498_v44 = vpop.f32.mrf.mxu0  ;;  %2283 = vmatprep.subr.bf16.mxu1 %v3656_v8  ;;  %v1332_v29 = vadd.f32 %v4761_v27, %v1159_v37  ;;  %v1169_v27 = vadd.f32 %v5289_v50, %v4491_v48  ;;  %v1173_v15 = vadd.f32 %v5290_v19, %v4486_v52  ;;  %v3657_v8 = vld [vmem:[%s5205_s3 + $0x260] ss:$8 sps:$4 sm:$0xff]   ;;  %v1175_v13 = vadd.f32 %v5291_v12, %v4491_v48  ;;  %v3672_v19 = vld [vmem:[%s5205_s3 + $0x210] ss:$8 sps:$4 sm:$0xff]  }
 0x1d5   : > { %v1570_v36 = vmax.f32 %v1495_v31, 0.0  ;;  %v1499_v54 = vadd.f32 %v1498_v44, %v1326_v49  ;;  %2197 = vmatprep.mubr.bf16.mxu1 %v4806_v0  ;;  %v3687_v12 = vld [vmem:[%s5207_s5 + $0x40] ss:$8 sps:$4 sm:$0xff]  }
 0x1d6   : > { %v1500_v11 = vpop.f32.mrf.mxu0  ;;  %2198 = vmatmul.mubr.bf16.gmra.mxu1 %v4747_v20  ;;  %v1342_v34 = vadd.f32 %v1341_v28, %v1169_v27  ;;  %v1346_v61 = vadd.f32 %v1345_v45, %v1173_v15  ;;  %v3678_v27 = vld [vmem:[%s5207_s5 + $0x70] ss:$8 sps:$4 sm:$0xff]   ;;  %v3677_v15 = vld [vmem:[%s5205_s3 + $0x204] ss:$8 sps:$4 sm:$0xff]  }
 0x1d7   : > { %v1604_v40 = vmax.f32 %v1569_v1, %v1570_v36  ;;  %v1501_v59 = vadd.f32 %v1500_v11, %v1328_v3  ;;  %2236 = vmatprep.mubr.bf16.mxu1 %v4684_v57  ;;  %v1571_v23 = vmax.f32 %v1499_v54, 0.0  ;;  %v5292_v3 = vld [vmem:[#allocation36_spill] sm:$0xff]  ;;  %v1348_v54 = vadd.f32 %v1347_v53, %v1175_v13  ;;  %v3665_v11 = vld [vmem:[%s5205_s3 + $0x244] ss:$8 sps:$4 sm:$0xff]   ;;  %v3675_v53 = vld [vmem:[%s5205_s3 + $0x200] ss:$8 sps:$4 sm:$0xff]  }
 0x1d8   : > { %v1502_v56 = vpop.f32.mrf.mxu0  ;;  %v1177_v44 = vadd.f32 %v5292_v3, %v4486_v52  ;;  %v3660_v1 = vld [vmem:[%s5205_s3 + $0x250] ss:$8 sps:$4 sm:$0xff]  }
 0x1d9   : > { %v1572_v21 = vmax.f32 %v1501_v59, 0.0  ;;  %v1503_v46 = vadd.f32 %v1502_v56, %v1330_v41  ;;  %v5293_v41 = vld [vmem:[#allocation38_spill] sm:$0xff]  ;;  %v3690_v13 = vld [vmem:[%s5207_s5 + $0x30] ss:$8 sps:$4 sm:$0xff]  }
 0x1da   : > { %v1504_v55 = vpop.f32.mrf.mxu0  ;;  %v1179_v60 = vadd.f32 %v5293_v41, %v4491_v48  ;;  %v3668_v48 = vld [vmem:[%s5205_s3 + $0x234] ss:$8 sps:$4 sm:$0xff]   ;;  %v3708_v3 = vld [vmem:[%s5207_s5 + $0xd0] ss:$8 sps:$4 sm:$0xff]  }
 0x1db   : > { %v1605_v47 = vmax.f32 %v1571_v23, %v1572_v21  ;;  %v1505_v17 = vadd.f32 %v1504_v55, %v1332_v29  ;;  %v1573_v24 = vmax.f32 %v1503_v46, 0.0  ;;  %v3663_v23 = vld [vmem:[%s5205_s3 + $0x240] ss:$8 sps:$4 sm:$0xff]   ;;  %v3720_v41 = vld [vmem:[%s5207_s5 + $0x90] ss:$8 sps:$4 sm:$0xff]  }
 0x1dc   : > { %v1508_v62 = vpop.f32.mrf.mxu0 }
 0x1dd   : > { %v1621_v26 = vmax.f32 %v4808_v63, %v1605_v47  ;;  %v1574_v35 = vmax.f32 %v1505_v17, 0.0  ;;  %v1509_v7 = vadd.f32 %v1508_v62, %v1336_v43  ;;  %v1349_v63 = vpop.f32.mrf.mxu1  ;;  %v3666_v47 = vld [vmem:[%s5205_s3 + $0x230] ss:$8 sps:$4 sm:$0xff]   ;;  %v3671_v17 = vld [vmem:[%s5205_s3 + $0x224] ss:$8 sps:$4 sm:$0xff]  }
 0x1de   : > { %v1510_v5 = vpop.f32.mrf.mxu0  ;;  %2237 = vmatmul.mubr.bf16.vlgmr.msra.gmra.mxu1 %v4621_v9  ;;  %v3662_v9 = vld [vmem:[%s5205_s3 + $0x254] ss:$8 sps:$4 sm:$0xff]   ;;  %v1350_v39 = vadd.f32 %v1349_v63, %v1177_v44  ;;  %v3705_v63 = vld [vmem:[%s5207_s5 + $0xe0] ss:$8 sps:$4 sm:$0xff]  }
 0x1df   : > { %v1606_v25 = vmax.f32 %v1573_v24, %v1574_v35  ;;  %v1511_v38 = vadd.f32 %v1510_v5, %v1338_v42  ;;  %2246 = vmatprep.mubr.bf16.mxu1 %v4747_v20  ;;  %2284 = vmatpush1.bf16.msra.mxu1 %v3654_v58  ;;  %v1575_v4 = vmax.f32 %v1509_v7, 0.0  ;;  %v1351_v59 = vpop.f32.mrf.mxu1  ;;  %v3680_v62 = vld [vmem:[%s5207_s5 + $0x74] ss:$8 sps:$4 sm:$0xff]   ;;  %v3681_v5 = vld [vmem:[%s5207_s5 + $0x60] ss:$8 sps:$4 sm:$0xff]  }
 0x1e0   : > { %v1512_v6 = vpop.f32.mrf.mxu0  ;;  %2285 = vmatprep.subr.bf16.mxu1 %v3659_v14  ;;  %v1352_v46 = vadd.f32 %v1351_v59, %v1179_v60  ;;  %v3674_v24 = vld [vmem:[%s5205_s3 + $0x214] ss:$8 sps:$4 sm:$0xff]   ;;  %2692 = vmatprep.subr.bf16.mxu0 %v3680_v62  ;;  %v3725_v60 = vld [vmem:[%s5207_s5 + $0x84] ss:$8 sps:$4 sm:$0xff]  }
 0x1e1   : > { %v1622_v49 = vmax.f32 %v1604_v40, %v1606_v25  ;;  %v1576_v18 = vmax.f32 %v1511_v38, 0.0  ;;  %v1513_v33 = vadd.f32 %v1512_v6, %v1340_v22  ;;  %2693 = vmatpush1.bf16.msra.mxu0 %v3678_v27  ;;  %v3683_v22 = vld [vmem:[%s5207_s5 + $0x64] ss:$8 sps:$4 sm:$0xff]   ;;  %v3684_v25 = vld [vmem:[%s5207_s5 + $0x50] ss:$8 sps:$4 sm:$0xff]  }
 0x1e2   : > { %v1514_v31 = vpop.f32.mrf.mxu0  ;;  %2694 = vmatprep.subr.bf16.mxu0 %v3683_v22  ;;  %v3686_v38 = vld [vmem:[%s5207_s5 + $0x54] ss:$8 sps:$4 sm:$0xff]  }
 0x1e3   : > { %v1607_v32 = vmax.f32 %v1575_v4, %v1576_v18  ;;  %v1515_v37 = vadd.f32 %v1514_v31, %v1342_v34  ;;  %2286 = vmatpush1.bf16.msra.mxu1 %v3657_v8  ;;  %v4851_v36 = vpack.c.bf16 %v1622_v49, %v1621_v26  ;;  %v1577_v52 = vmax.f32 %v1513_v33, 0.0  ;;  %v3669_v26 = vld [vmem:[%s5205_s3 + $0x220] ss:$8 sps:$4 sm:$0xff]   ;;  %v3689_v8 = vld [vmem:[%s5207_s5 + $0x44] ss:$8 sps:$4 sm:$0xff]  }
 0x1e4   : > { %v1518_v28 = vpop.f32.mrf.mxu0  ;;  %2287 = vmatprep.subr.bf16.mxu1 %v3662_v9  ;;  %v5294_v34 = vmov 0   ;;  %v3692_v6 = vld [vmem:[%s5207_s5 + $0x34] ss:$8 sps:$4 sm:$0xff]   ;;  %v3695_v9 = vld [vmem:[%s5207_s5 + $0x24] ss:$8 sps:$4 sm:$0xff]  }
 0x1e5   : > { %v1578_v2 = vmax.f32 %v1515_v37, 0.0  ;;  %v1519_v40 = vadd.f32 %v1518_v28, %v1346_v61  ;;  %2695 = vmatpush1.bf16.msra.mxu0 %v3681_v5  ;;  %v3698_v49 = vld [vmem:[%s5207_s5 + $0x14] ss:$8 sps:$4 sm:$0xff]   ;;  %v3699_v4 = vld [vmem:[%s5207_s5] ss:$8 sps:$4 sm:$0xff]  }
 0x1e6   : > { %v1520_v16 = vpop.f32.mrf.mxu0  ;;  %2247 = vmatmul.mubr.bf16.gmra.mxu1 %v4684_v57  ;;  %2696 = vmatprep.subr.bf16.mxu0 %v3686_v38  ;;  %v3701_v18 = vld [vmem:[%s5207_s5 + $0x4] ss:$8 sps:$4 sm:$0xff]   ;;  %v3702_v33 = vld [vmem:[%s5207_s5 + $0xf0] ss:$8 sps:$4 sm:$0xff]   ;;  %v3704_v61 = vld [vmem:[%s5207_s5 + $0xf4] ss:$8 sps:$4 sm:$0xff]  }
 0x1e7   : > { %v1608_v56 = vmax.f32 %v1577_v52, %v1578_v2  ;;  %v1521_v29 = vadd.f32 %v1520_v16, %v1348_v54  ;;  %2256 = vmatprep.mubr.bf16.mxu1 %v4806_v0  ;;  %2288 = vmatpush1.bf16.msra.mxu1 %v3660_v1  ;;  %v1579_v45 = vmax.f32 %v1519_v40, 0.0  ;;  %v3707_v31 = vld [vmem:[%s5207_s5 + $0xe4] ss:$8 sps:$4 sm:$0xff]   ;;  %v3710_v44 = vld [vmem:[%s5207_s5 + $0xd4] ss:$8 sps:$4 sm:$0xff]  }
 0x1e8   : > { %v1522_v21 = vpop.f32.mrf.mxu0  ;;  %2289 = vmatprep.subr.bf16.mxu1 %v3665_v11  ;;  %v3713_v37 = vld [vmem:[%s5207_s5 + $0xc4] ss:$8 sps:$4 sm:$0xff]   ;;  %v3714_v1 = vld [vmem:[%s5207_s5 + $0xb0] ss:$8 sps:$4 sm:$0xff]   ;;  %v3717_v54 = vld [vmem:[%s5207_s5 + $0xa0] ss:$8 sps:$4 sm:$0xff]  }
 0x1e9   : > { %v1580_v55 = vmax.f32 %v1521_v29, 0.0  ;;  %v1523_v57 = vadd.f32 %v1522_v21, %v1350_v39  ;;  %2697 = vmatpush1.bf16.msra.mxu0 %v3684_v25  ;;  %v3719_v28 = vld [vmem:[%s5207_s5 + $0xa4] ss:$8 sps:$4 sm:$0xff]   ;;  %v3722_v11 = vld [vmem:[%s5207_s5 + $0x94] ss:$8 sps:$4 sm:$0xff]  }
 0x1ea   : > { %v1524_v43 = vpop.f32.mrf.mxu0  ;;  %2698 = vmatprep.subr.bf16.mxu0 %v3689_v8  ;;  %v3723_v52 = vld [vmem:[%s5207_s5 + $0x80] ss:$8 sps:$4 sm:$0xff]   ;;  %v3728_v2 = vld [vmem:[%s5207_s5 + $0x174] ss:$8 sps:$4 sm:$0xff]  }
 0x1eb   : > { %v1609_v10 = vmax.f32 %v1579_v45, %v1580_v55  ;;  %v1525_v30 = vadd.f32 %v1524_v43, %v1352_v46  ;;  %2290 = vmatpush1.bf16.msra.mxu1 %v3663_v23  ;;  %v1581_v42 = vmax.f32 %v1523_v57, 0.0  ;;  %v1713_v8 = vld [vmem:[%s5206_s4] sm:$0x3] }
 0x1ec   : > { %2291 = vmatprep.subr.bf16.mxu1 %v3668_v48 }
 0x1ed   : > { %v1623_v58 = vmax.f32 %v1607_v32, %v1609_v10  ;;  %v1582_v50 = vmax.f32 %v1525_v30, 0.0  ;;  %2699 = vmatpush1.bf16.msra.mxu0 %v3687_v12  ;;  %v3711_v32 = vld [vmem:[%s5207_s5 + $0xc0] ss:$8 sps:$4 sm:$0xff]  }
 0x1ee   : > { %2257 = vmatmul.mubr.bf16.gmra.mxu1 %v4747_v20  ;;  %2700 = vmatprep.subr.bf16.mxu0 %v3692_v6  ;;  %v5295_v6 = vld [vmem:[#allocation28_spill] sm:$0xff] }
 0x1ef   : > { %v1610_v14 = vmax.f32 %v1581_v42, %v1582_v50  ;;  %2266 = vmatprep.mubr.bf16.mxu1 %v4851_v36  ;;  %2292 = vmatpush1.bf16.msra.mxu1 %v3666_v47 }
 0x1f0   : > { %2293 = vmatprep.subr.bf16.mxu1 %v3671_v17 }
 0x1f1   : > { %v1624_v35 = vmax.f32 %v1608_v56, %v1610_v14  ;;  %2701 = vmatpush1.bf16.msra.mxu0 %v3690_v13 }
 0x1f2   : > { %2702 = vmatprep.subr.bf16.mxu0 %v3695_v9  ;;  %v5033_v9 = vrot.slane %v1713_v8, %v5295_v6 }
 0x1f3   : > { %v1632_v7 = vpack.c.bf16 %v1624_v35, %v1623_v58  ;;  %2294 = vmatpush1.bf16.msra.mxu1 %v3669_v26 }
 0x1f4   : > { %2295 = vmatprep.subr.bf16.mxu1 %v3674_v24 }
 0x1f6   : > { %2267 = vmatmul.mubr.bf16.gmra.mxu1 %v4806_v0 }
 0x1f7   : > { %2276 = vmatprep.mubr.bf16.mxu1 %v1632_v7  ;;  %2296 = vmatpush1.bf16.msra.mxu1 %v3672_v19 }
 0x1f8   : > { %2297 = vmatprep.subr.bf16.mxu1 %v3677_v15 }
 0x1fb   : > { %2298 = vmatpush1.bf16.msra.mxu1 %v3675_v53 }
 0x1fe   : > { %2277 = vmatmul.mubr.bf16.gmra.mxu1 %v4851_v36 }
 0x1ff   : > { %2315 = vmatprep.mubr.bf16.mxu1 %v5294_v34 }
 0x206   : > { %2316 = vmatmul.mubr.bf16.vlgmr.msra.gmra.mxu1 %v4747_v20  ;;  %v3693_v20 = vld [vmem:[%s5207_s5 + $0x20] ss:$8 sps:$4 sm:$0xff]  }
 0x207   : > { %2325 = vmatprep.mubr.bf16.mxu1 %v5294_v34  ;;  %2703 = vmatpush1.bf16.msra.mxu0 %v3693_v20 }
 0x208   : > { %2704 = vmatprep.subr.bf16.mxu0 %v3698_v49 }
 0x20e   : > { %2326 = vmatmul.mubr.bf16.gmra.mxu1 %v4806_v0  ;;  %v3696_v0 = vld [vmem:[%s5207_s5 + $0x10] ss:$8 sps:$4 sm:$0xff]  }
 0x20f   : > { %2335 = vmatprep.mubr.bf16.mxu1 %v5294_v34  ;;  %2705 = vmatpush1.bf16.msra.mxu0 %v3696_v0  ;;  %v5296_v0 = vld [vmem:[#allocation30_spill] sm:$0xff] }
 0x210   : > { %2706 = vmatprep.subr.bf16.mxu0 %v3701_v18  ;;  %v5036_v49 = vrot.slane %v1713_v8, %v5296_v0 }
 0x213   : > { %2707 = vmatpush1.bf16.msra.mxu0 %v3699_v4 }
 0x214   : > { %2708 = vmatprep.subr.bf16.mxu0 %v3704_v61 }
 0x216   : > { %2336 = vmatmul.mubr.bf16.gmra.mxu1 %v4851_v36  ;;  %v3716_v36 = vld [vmem:[%s5207_s5 + $0xb4] ss:$8 sps:$4 sm:$0xff]  }
 0x217   : > { %2345 = vmatprep.mubr.bf16.mxu1 %v5294_v34  ;;  %2709 = vmatpush2.bf16.msra.mxu0 %v3702_v33 }
 0x218   : > { %2710 = vmatprep.subr.bf16.mxu0 %v3707_v31 }
 0x21b   : > { %2711 = vmatpush2.bf16.msra.mxu0 %v3705_v63 }
 0x21c   : > { %2712 = vmatprep.subr.bf16.mxu0 %v3710_v44 }
 0x21e   : > { %2346 = vmatmul.mubr.bf16.gmra.mxu1 %v1632_v7 }
 0x21f   : > { %2355 = vmatprep.mubr.bf16.mxu1 %v5294_v34  ;;  %2713 = vmatpush2.bf16.msra.mxu0 %v3708_v3 }
 0x220   : > { %2714 = vmatprep.subr.bf16.mxu0 %v3713_v37 }
 0x223   : > { %2715 = vmatpush2.bf16.msra.mxu0 %v3711_v32 }
 0x224   : > { %2716 = vmatprep.subr.bf16.mxu0 %v3716_v36 }
 0x226   : > { %2356 = vmatmul.mubr.bf16.gmra.mxu1 %v3775_v51 }
 0x227   : > { %2717 = vmatpush2.bf16.msra.mxu0 %v3714_v1 }
 0x228   : > { %2718 = vmatprep.subr.bf16.mxu0 %v3719_v28 }
 0x22b   : > { %2719 = vmatpush2.bf16.msra.mxu0 %v3717_v54 }
 0x22c   : > { %2720 = vmatprep.subr.bf16.mxu0 %v3722_v11 }
 0x22f   : > { %2721 = vmatpush2.bf16.msra.mxu0 %v3720_v41 }
 0x230   : > { %2722 = vmatprep.subr.bf16.mxu0 %v3725_v60 }
 0x233   : > { %2723 = vmatpush2.bf16.msra.mxu0 %v3723_v52 }
 0x234   : > { %2745 = vmatprep.subr.bf16.mxu0 %v3728_v2 }
 0x256   : > { %v2159_v40 = vpop.f32.mrf.mxu1 }
 0x257   : > { %v2160_v18 = vadd.f32 %v2159_v40, %v5033_v9 }
 0x258   : > { %v2161_v59 = vpop.f32.mrf.mxu1 }
 0x259   : > { %v2162_v61 = vadd.f32 %v2161_v59, %v5036_v49 }
 0x25a   : > { %v2163_v16 = vpop.f32.mrf.mxu1 }
 0x25b   : > { %v2164_v3 = vadd.f32 %v2163_v16, %v5033_v9 }
 0x25c   : > { %v2165_v39 = vpop.f32.mrf.mxu1 }
 0x25d   : > { %v2166_v1 = vadd.f32 %v2165_v39, %v5036_v49 }
 0x266   : > { %v2169_v56 = vpop.f32.mrf.mxu1 }
 0x267   : > { %v2170_v28 = vadd.f32 %v2169_v56, %v5033_v9 }
 0x268   : > { %v2171_v29 = vpop.f32.mrf.mxu1 }
 0x269   : > { %v2172_v59 = vadd.f32 %v2171_v29, %v5036_v49 }
 0x26a   : > { %v2173_v23 = vpop.f32.mrf.mxu1 }
 0x26c   : > { %v4999_v21 = vpop.f32.mrf.mxu1 }
 0x26d   : > { %v2176_v56 = vadd.f32 %v4999_v21, %v5036_v49 }
 0x276   : > { %v5001_v48 = vpop.f32.mrf.mxu1 }
 0x277   : > { %v2180_v29 = vadd.f32 %v5001_v48, %v5033_v9 }
 0x278   : > { %v5003_v46 = vpop.f32.mrf.mxu1 }
 0x27a   : > { %v5005_v45 = vpop.f32.mrf.mxu1 }
 0x27b   : > { %v2184_v21 = vadd.f32 %v5005_v45, %v5033_v9 }
 0x27c   : > { %v5007_v55 = vpop.f32.mrf.mxu1 }
 0x286   : > { %v5009_v57 = vpop.f32.mrf.mxu1 }
 0x288   : > { %v5011_v43 = vpop.f32.mrf.mxu1 }
 0x28a   : > { %v5013_v10 = vpop.f32.mrf.mxu1 }
 0x28c   : > { %v5015_v30 = vpop.f32.mrf.mxu1 }
 0x296   : > { %v2199_v47 = vpop.f32.mrf.mxu1 }
 0x298   : > { %v2200_v17 = vpop.f32.mrf.mxu1 }
 0x29a   : > { %v2201_v58 = vpop.f32.mrf.mxu1 }
 0x29b   : > { %v2174_v58 = vadd.f32 %v2173_v23, %v5033_v9 }
 0x29c   : > { %v2202_v42 = vpop.f32.mrf.mxu1 }
 0x29e   : > { %v2238_v50 = vpop.f32.mrf.mxu1 }
 0x29f   : > { %v2239_v63 = vadd.f32 %v2238_v50, %v2160_v18 }
 0x2a0   : > { %v2240_v27 = vpop.f32.mrf.mxu1 }
 0x2a1   : > { %v2241_v44 = vadd.f32 %v2240_v27, %v2162_v61 }
 0x2a2   : > { %v2242_v62 = vpop.f32.mrf.mxu1 }
 0x2a3   : > { %v2243_v36 = vadd.f32 %v2242_v62, %v2164_v3 }
 0x2a4   : > { %v2244_v14 = vpop.f32.mrf.mxu1 }
 0x2a5   : > { %v2245_v41 = vadd.f32 %v2244_v14, %v2166_v1 }
 0x2a6   : > { %v2248_v26 = vpop.f32.mrf.mxu1 }
 0x2a7   : > { %v2249_v47 = vadd.f32 %v2248_v26, %v2170_v28 }
 0x2a8   : > { %v2250_v24 = vpop.f32.mrf.mxu1 }
 0x2a9   : > { %v2251_v50 = vadd.f32 %v2250_v24, %v2172_v59  ;;  %v2182_v24 = vadd.f32 %v5003_v46, %v5036_v49 }
 0x2aa   : > { %v2252_v35 = vpop.f32.mrf.mxu1 }
 0x2ab   : > { %v2253_v14 = vadd.f32 %v2252_v35, %v2174_v58 }
 0x2ac   : > { %v2254_v7 = vpop.f32.mrf.mxu1 }
 0x2ae   : > { %v2258_v19 = vpop.f32.mrf.mxu1 }
 0x2b0   : > { %v2260_v15 = vpop.f32.mrf.mxu1 }
 0x2b1   : > { %v2261_v35 = vadd.f32 %v2260_v15, %v2182_v24 }
 0x2b2   : > { %v5017_v53 = vpop.f32.mrf.mxu1 }
 0x2b4   : > { %v5019_v5 = vpop.f32.mrf.mxu1 }
 0x2b6   : > { %v5021_v22 = vpop.f32.mrf.mxu1 }
 0x2b8   : > { %v5023_v25 = vpop.f32.mrf.mxu1 }
 0x2ba   : > { %v5025_v38 = vpop.f32.mrf.mxu1 }
 0x2bc   : > { %v5030_v12 = vpop.f32.mrf.mxu1 }
 0x2be   : > { %v2278_v13 = vpop.f32.mrf.mxu1 }
 0x2c0   : > { %v2279_v20 = vpop.f32.mrf.mxu1 }
 0x2c2   : > { %v2280_v4 = vpop.f32.mrf.mxu1 }
 0x2c3   : > { %v2255_v4 = vadd.f32 %v2254_v7, %v2176_v56  ;;  %v2186_v7 = vadd.f32 %v5007_v55, %v5036_v49 }
 0x2c4   : > { %v2281_v33 = vpop.f32.mrf.mxu1 }
 0x2c6   : > { %v2317_v31 = vpop.f32.mrf.mxu1 }
 0x2c7   : > { %v2318_v32 = vadd.f32 %v2317_v31, %v2239_v63  ;;  %v2259_v63 = vadd.f32 %v2258_v19, %v2180_v29  ;;  %v2190_v19 = vadd.f32 %v5009_v57, %v5033_v9  ;;  %v3726_v57 = vld [vmem:[%s5207_s5 + $0x170] ss:$8 sps:$4 sm:$0xff]  }
 0x2c8   : > { %v2319_v37 = vpop.f32.mrf.mxu1  ;;  %v3732_v29 = vld [vmem:[%s5207_s5 + $0x150] ss:$8 sps:$4 sm:$0xff]  }
 0x2c9   : > { %v2320_v54 = vadd.f32 %v2319_v37, %v2241_v44  ;;  %v2362_v60 = vmax.f32 %v2318_v32, 0.0  ;;  %v2269_v55 = vadd.f32 %v5021_v22, %v2190_v19  ;;  %v3754_v19 = vld [vmem:[%s5209_s7 + $0x18] sm:$0xff]  }
 0x2ca   : > { %v2321_v11 = vpop.f32.mrf.mxu1 }
 0x2cb   : > { %v2363_v52 = vmax.f32 %v2320_v54, 0.0  ;;  %v2322_v2 = vadd.f32 %v2321_v11, %v2243_v36  ;;  %v2263_v54 = vadd.f32 %v5017_v53, %v2184_v21  ;;  %v2265_v11 = vadd.f32 %v5019_v5, %v2186_v7  ;;  %v3749_v7 = vld [vmem:[%s5207_s5 + $0x104] ss:$8 sps:$4 sm:$0xff]  }
 0x2cc   : > { %v2323_v40 = vpop.f32.mrf.mxu1  ;;  %v2194_v5 = vadd.f32 %v5013_v10, %v5033_v9 }
 0x2cd   : > { %v2378_v17 = vmax.f32 %v2362_v60, %v2363_v52  ;;  %v2324_v16 = vadd.f32 %v2323_v40, %v2245_v41  ;;  %v2364_v39 = vmax.f32 %v2322_v2, 0.0  ;;  %v2192_v2 = vadd.f32 %v5011_v43, %v5036_v49 }
 0x2ce   : > { %v2327_v42 = vpop.f32.mrf.mxu1 }
 0x2cf   : > { %v2365_v27 = vmax.f32 %v2324_v16, 0.0  ;;  %v2328_v62 = vadd.f32 %v2327_v42, %v2249_v47  ;;  %v3731_v16 = vld [vmem:[%s5207_s5 + $0x164] ss:$8 sps:$4 sm:$0xff]   ;;  %v2271_v43 = vadd.f32 %v5023_v25, %v2192_v2 }
 0x2d0   : > { %v2329_v8 = vpop.f32.mrf.mxu1  ;;  %v3761_v2 = vld [vmem:[%s5211_s9 + $0x20] sm:$0xff]  }
 0x2d1   : > { %v2379_v13 = vmax.f32 %v2364_v39, %v2365_v27  ;;  %v2330_v20 = vadd.f32 %v2329_v8, %v2251_v50  ;;  %v2366_v18 = vmax.f32 %v2328_v62, 0.0  ;;  %v2196_v39 = vadd.f32 %v5015_v30, %v5036_v49  ;;  %v3729_v62 = vld [vmem:[%s5207_s5 + $0x160] ss:$8 sps:$4 sm:$0xff]   ;;  %v3734_v8 = vld [vmem:[%s5207_s5 + $0x154] ss:$8 sps:$4 sm:$0xff]  }
 0x2d2   : > { %v2331_v26 = vpop.f32.mrf.mxu1  ;;  %v2273_v27 = vadd.f32 %v5025_v38, %v2194_v5 }
 0x2d3   : > { %v2367_v33 = vmax.f32 %v2330_v20, 0.0  ;;  %v2332_v23 = vadd.f32 %v2331_v26, %v2253_v14  ;;  %v2275_v56 = vadd.f32 %v5030_v12, %v2196_v39  ;;  %v3737_v26 = vld [vmem:[%s5207_s5 + $0x144] ss:$8 sps:$4 sm:$0xff]  }
 0x2d4   : > { %v2333_v61 = vpop.f32.mrf.mxu1 }
 0x2d5   : > { %v2380_v31 = vmax.f32 %v2366_v18, %v2367_v33  ;;  %v2334_v3 = vadd.f32 %v2333_v61, %v2255_v4  ;;  %v2368_v37 = vmax.f32 %v2332_v23, 0.0  ;;  %v3735_v61 = vld [vmem:[%s5207_s5 + $0x140] ss:$8 sps:$4 sm:$0xff]  }
 0x2d6   : > { %v2337_v44 = vpop.f32.mrf.mxu1 }
 0x2d7   : > { %v2386_v32 = vmax.f32 %v2378_v17, %v2380_v31  ;;  %v2369_v48 = vmax.f32 %v2334_v3, 0.0  ;;  %v2338_v1 = vadd.f32 %v2337_v44, %v2259_v63  ;;  %v3740_v63 = vld [vmem:[%s5207_s5 + $0x134] ss:$8 sps:$4 sm:$0xff]   ;;  %v3738_v44 = vld [vmem:[%s5207_s5 + $0x130] ss:$8 sps:$4 sm:$0xff]  }
 0x2d8   : > { %v2339_v36 = vpop.f32.mrf.mxu1 }
 0x2d9   : > { %v2381_v46 = vmax.f32 %v2368_v37, %v2369_v48  ;;  %v2340_v28 = vadd.f32 %v2339_v36, %v2261_v35  ;;  %v2370_v41 = vmax.f32 %v2338_v1, 0.0  ;;  %v3741_v37 = vld [vmem:[%s5207_s5 + $0x120] ss:$8 sps:$4 sm:$0xff]   ;;  %v3746_v48 = vld [vmem:[%s5207_s5 + $0x114] ss:$8 sps:$4 sm:$0xff]  }
 0x2da   : > { %v2341_v45 = vpop.f32.mrf.mxu1  ;;  %v3744_v1 = vld [vmem:[%s5207_s5 + $0x110] ss:$8 sps:$4 sm:$0xff]   ;;  %v3747_v36 = vld [vmem:[%s5207_s5 + $0x100] ss:$8 sps:$4 sm:$0xff]  }
 0x2db   : > { %v2387_v15 = vmax.f32 %v2379_v13, %v2381_v46  ;;  %v2371_v60 = vmax.f32 %v2340_v28, 0.0  ;;  %v2342_v52 = vadd.f32 %v2341_v45, %v2263_v54  ;;  %v3750_v54 = vld [vmem:[%s5209_s7 + $0x38] sm:$0xff]   ;;  %v3776_v46 = vmov 0.0   ;;  %v3751_v28 = vld [vmem:[%s5209_s7 + $0x30] sm:$0xff]   ;;  %v3756_v45 = vld [vmem:[%s5209_s7 + $0x8] sm:$0xff]  }
 0x2dc   : > { %v2343_v40 = vpop.f32.mrf.mxu1  ;;  %3370 = vmatprep.subr.bf16.mxu1 %v3776_v46  ;;  %3386 = vmatprep.mubr.msk.bf16.mxu1 %vm3777_vm0, %v3776_v46 }
 0x2dd   : > { %v2382_v59 = vmax.f32 %v2370_v41, %v2371_v60  ;;  %v2344_v53 = vadd.f32 %v2343_v40, %v2265_v11  ;;  %v2390_v47 = vpack.c.bf16 %v2387_v15, %v2386_v32  ;;  %v2372_v58 = vmax.f32 %v2342_v52, 0.0  ;;  %v3743_v32 = vld [vmem:[%s5207_s5 + $0x124] ss:$8 sps:$4 sm:$0xff]   ;;  %3371 = vmatpush3.bf16.msra.mxu1 %v3750_v54  ;;  %v3755_v11 = vld [vmem:[%s5209_s7 + $0x10] sm:$0xff]   ;;  %v3758_v41 = vld [vmem:[%s5211_s9 + $0x38] sm:$0xff]  }
 0x2de   : > { %v2347_v17 = vpop.f32.mrf.mxu1  ;;  %3372 = vmatprep.subr.bf16.mxu1 %v3776_v46  ;;  %v3757_v15 = vld [vmem:[%s5209_s7] sm:$0xff]   ;;  %v3759_v60 = vld [vmem:[%s5211_s9 + $0x30] sm:$0xff]   ;;  %v3760_v52 = vld [vmem:[%s5211_s9 + $0x28] sm:$0xff]  }
 0x2df   : > { %v2373_v42 = vmax.f32 %v2344_v53, 0.0  ;;  %v2348_v22 = vadd.f32 %v2347_v17, %v2269_v55  ;;  %2724 = vmatprep.mubr.bf16.mxu0 %v2390_v47  ;;  %v3762_v40 = vld [vmem:[%s5211_s9 + $0x18] sm:$0xff]   ;;  %v3763_v55 = vld [vmem:[%s5211_s9 + $0x10] sm:$0xff]  }
 0x2e0   : > { %v2349_v50 = vpop.f32.mrf.mxu1  ;;  %2725 = vmatmul.mubr.bf16.vlgmr.msra.gmra.mxu0 %v3775_v51 }
 0x2e1   : > { %v2383_v10 = vmax.f32 %v2372_v58, %v2373_v42  ;;  %v2350_v9 = vadd.f32 %v2349_v50, %v2271_v43  ;;  %2746 = vmatpush1.bf16.msra.mxu0 %v3726_v57  ;;  %v2374_v14 = vmax.f32 %v2348_v22, 0.0  ;;  %3373 = vmatpush3.bf16.msra.mxu1 %v3751_v28  ;;  %v2440_v22 = vld [vmem:[%s5208_s6] sm:$0x3]  ;;  %v3764_v28 = vld [vmem:[%s5211_s9 + $0x8] sm:$0xff]  }
 0x2e2   : > { %v2351_v25 = vpop.f32.mrf.mxu1  ;;  %2747 = vmatprep.subr.bf16.mxu0 %v3731_v16  ;;  %3374 = vmatprep.subr.bf16.mxu1 %v3776_v46  ;;  %v2449_v39 = vrot.slane %v2440_v22, %v5296_v0 }
 0x2e3   : > { %v2375_v13 = vmax.f32 %v2350_v9, 0.0  ;;  %v2352_v30 = vadd.f32 %v2351_v25, %v2273_v27  ;;  %v2445_v27 = vrot.slane %v2440_v22, %v5295_v6 }
 0x2e4   : > { %v2353_v49 = vpop.f32.mrf.mxu1 }
 0x2e5   : > { %v2384_v38 = vmax.f32 %v2374_v14, %v2375_v13  ;;  %v2354_v20 = vadd.f32 %v2353_v49, %v2275_v56  ;;  %2748 = vmatpush1.bf16.msra.mxu0 %v3729_v62  ;;  %v2376_v33 = vmax.f32 %v2352_v30, 0.0 }
 0x2e6   : > { %2749 = vmatprep.subr.bf16.mxu0 %v3734_v8  ;;  %v2357_v4 = vpop.f32.mrf.mxu1 }
 0x2e7   : > { %v2388_v18 = vmax.f32 %v2382_v59, %v2384_v38  ;;  %v2377_v12 = vmax.f32 %v2354_v20, 0.0 }
 0x2e8   : > { %v2358_v23 = vpop.f32.mrf.mxu1 }
 0x2e9   : > { %v2385_v24 = vmax.f32 %v2376_v33, %v2377_v12  ;;  %2750 = vmatpush1.bf16.msra.mxu0 %v3732_v29 }
 0x2ea   : > { %2751 = vmatprep.subr.bf16.mxu0 %v3737_v26  ;;  %v2359_v31 = vpop.f32.mrf.mxu1 }
 0x2eb   : > { %v2389_v3 = vmax.f32 %v2383_v10, %v2385_v24 }
 0x2ec   : > { %v2360_v21 = vpop.f32.mrf.mxu1 }
 0x2ed   : > { %2752 = vmatpush1.bf16.msra.mxu0 %v3735_v61  ;;  %v2391_v35 = vpack.c.bf16 %v2389_v3, %v2388_v18 }
 0x2ee   : > { %2753 = vmatprep.subr.bf16.mxu0 %v3740_v63 }
 0x2ef   : > { %2734 = vmatprep.mubr.bf16.mxu0 %v2391_v35 }
 0x2f0   : > { %2735 = vmatmul.mubr.bf16.gmra.mxu0 %v2390_v47 }
 0x2f1   : > { %2754 = vmatpush1.bf16.msra.mxu0 %v3738_v44  ;;  %2777 = vmatprep.mubr.bf16.mxu0 %v5294_v34 }
 0x2f2   : > { %2755 = vmatprep.subr.bf16.mxu0 %v3743_v32 }
 0x2f5   : > { %2756 = vmatpush1.bf16.msra.mxu0 %v3741_v37 }
 0x2f6   : > { %2757 = vmatprep.subr.bf16.mxu0 %v3746_v48 }
 0x2f9   : > { %2758 = vmatpush1.bf16.msra.mxu0 %v3744_v1 }
 0x2fa   : > { %2759 = vmatprep.subr.bf16.mxu0 %v3749_v7 }
 0x2fd   : > { %2760 = vmatpush1.bf16.msra.mxu0 %v3747_v36 }
 0x2fe   : > { %3390 = vmatprep.subr.bf16.mxu0 %v3776_v46 }
 0x300   : > { %2778 = vmatmul.mubr.bf16.vlgmr.msra.gmra.mxu0 %v2391_v35 }
 0x301   : > { %2787 = vmatprep.mubr.bf16.mxu0 %v5294_v34  ;;  %v3753_v34 = vld [vmem:[%s5209_s7 + $0x20] sm:$0xff]   ;;  %3391 = vmatpush3.bf16.msra.mxu0 %v3758_v41 }
 0x302   : > { %3392 = vmatprep.subr.bf16.mxu0 %v3776_v46 }
 0x305   : > { %3393 = vmatpush3.bf16.msra.mxu0 %v3759_v60 }
 0x306   : > { %3394 = vmatprep.subr.bf16.mxu0 %v3776_v46 }
 0x308   : > { %2788 = vmatmul.mubr.bf16.gmra.mxu0 %v3775_v51  ;;  %v3752_v51 = vld [vmem:[%s5209_s7 + $0x28] sm:$0xff]  }
 0x309   : > { %3375 = vmatpush3.bf16.msra.mxu1 %v3752_v51  ;;  %3406 = vmatprep.mubr.msk.bf16.mxu0 %vm3777_vm0, %v3776_v46  ;;  %v3765_v51 = vld [vmem:[%s5211_s9] sm:$0xff]  }
 0x30a   : > { %3376 = vmatprep.subr.bf16.mxu1 %v3776_v46  ;;  %3395 = vmatpush3.bf16.msra.mxu0 %v3760_v52 }
 0x30b   : > { %3396 = vmatprep.subr.bf16.mxu0 %v3776_v46 }
 0x30d   : > { %3377 = vmatpush3.bf16.msra.mxu1 %v3753_v34 }
 0x30e   : > { %3378 = vmatprep.subr.bf16.mxu1 %v3776_v46  ;;  %3397 = vmatpush3.bf16.msra.mxu0 %v3761_v2 }
 0x30f   : > { %3398 = vmatprep.subr.bf16.mxu0 %v3776_v46 }
 0x311   : > { %3379 = vmatpush3.bf16.msra.mxu1 %v3754_v19  ;;  %v3338_v19 = vld [vmem:[%s5210_s8] ss:$0 sm:$0xff] }
 0x312   : > { %3380 = vmatprep.subr.bf16.mxu1 %v3776_v46  ;;  %3399 = vmatpush3.bf16.msra.mxu0 %v3762_v40 }
 0x313   : > { %3400 = vmatprep.subr.bf16.mxu0 %v3776_v46 }
 0x315   : > { %3381 = vmatpush3.bf16.msra.mxu1 %v3755_v11 }
 0x316   : > { %3382 = vmatprep.subr.bf16.mxu1 %v3776_v46  ;;  %3401 = vmatpush3.bf16.msra.mxu0 %v3763_v55 }
 0x317   : > { %3402 = vmatprep.subr.bf16.mxu0 %v3776_v46 }
 0x319   : > { %3383 = vmatpush3.bf16.msra.mxu1 %v3756_v45 }
 0x31a   : > { %3384 = vmatprep.subr.bf16.mxu1 %v3776_v46  ;;  %3403 = vmatpush3.bf16.msra.mxu0 %v3764_v28 }
 0x31b   : > { %3404 = vmatprep.subr.bf16.mxu0 %v3776_v46  ;;  %v3339_v46 = vld [vmem:[%s5212_s10] ss:$0 sm:$0xff] }
 0x31d   : > { %3385 = vmatpush3.bf16.msra.mxu1 %v3757_v15 }
 0x31e   : > { %3405 = vmatpush3.bf16.msra.mxu0 %v3765_v51 }
 0x3a0   : > { %v2726_v59 = vpop.f32.mrf.mxu0 }
 0x3a1   : > { %v2727_v14 = vadd.f32 %v2726_v59, %v2445_v27 }
 0x3a2   : > { %v2728_v53 = vpop.f32.mrf.mxu0 }
 0x3a3   : > { %v2729_v62 = vadd.f32 %v2728_v53, %v2449_v39 }
 0x3a4   : > { %v2730_v47 = vpop.f32.mrf.mxu0 }
 0x3a5   : > { %v2731_v13 = vadd.f32 %v2730_v47, %v2445_v27 }
 0x3a6   : > { %v2732_v57 = vpop.f32.mrf.mxu0 }
 0x3a7   : > { %v2733_v25 = vadd.f32 %v2732_v57, %v2449_v39 }
 0x3b0   : > { %v2736_v5 = vpop.f32.mrf.mxu0 }
 0x3b1   : > { %v2737_v8 = vadd.f32 %v2736_v5, %v2445_v27 }
 0x3b2   : > { %v2738_v17 = vpop.f32.mrf.mxu0 }
 0x3b3   : > { %v2739_v56 = vadd.f32 %v2738_v17, %v2449_v39 }
 0x3b4   : > { %v2740_v16 = vpop.f32.mrf.mxu0 }
 0x3b5   : > { %v2741_v30 = vadd.f32 %v2740_v16, %v2445_v27 }
 0x3b6   : > { %v2742_v43 = vpop.f32.mrf.mxu0 }
 0x3b7   : > { %v2743_v33 = vadd.f32 %v2742_v43, %v2449_v39 }
 0x3c0   : > { %v2779_v58 = vpop.f32.mrf.mxu0 }
 0x3c1   : > { %v2780_v4 = vadd.f32 %v2779_v58, %v2727_v14 }
 0x3c2   : > { %v2781_v42 = vpop.f32.mrf.mxu0 }
 0x3c3   : > { %v2782_v38 = vadd.f32 %v2781_v42, %v2729_v62  ;;  %v2798_v3 = vmax.f32 %v2780_v4, 0.0 }
 0x3c4   : > { %v2783_v50 = vpop.f32.mrf.mxu0 }
 0x3c5   : > { %v2784_v0 = vadd.f32 %v2783_v50, %v2731_v13  ;;  %v2799_v24 = vmax.f32 %v2782_v38, 0.0 }
 0x3c6   : > { %v2785_v10 = vpop.f32.mrf.mxu0 }
 0x3c7   : > { %v2786_v20 = vadd.f32 %v2785_v10, %v2733_v25  ;;  %v2800_v21 = vmax.f32 %v2784_v0, 0.0  ;;  %v2806_v37 = vmax.f32 %v2798_v3, %v2799_v24 }
 0x3c8   : > { %v2789_v9 = vpop.f32.mrf.mxu0 }
 0x3c9   : > { %v2790_v29 = vadd.f32 %v2789_v9, %v2737_v8  ;;  %v2801_v61 = vmax.f32 %v2786_v20, 0.0 }
 0x3ca   : > { %v2791_v49 = vpop.f32.mrf.mxu0 }
 0x3cb   : > { %v2792_v26 = vadd.f32 %v2791_v49, %v2739_v56  ;;  %v2802_v63 = vmax.f32 %v2790_v29, 0.0  ;;  %v2807_v48 = vmax.f32 %v2800_v21, %v2801_v61 }
 0x3cc   : > { %v2793_v18 = vpop.f32.mrf.mxu0 }
 0x3cd   : > { %v2803_v12 = vmax.f32 %v2792_v26, 0.0  ;;  %v2794_v6 = vadd.f32 %v2793_v18, %v2741_v30 }
 0x3ce   : > { %v2795_v23 = vpop.f32.mrf.mxu0 }
 0x3cf   : > { %v2796_v31 = vadd.f32 %v2795_v23, %v2743_v33  ;;  %v2808_v35 = vmax.f32 %v2802_v63, %v2803_v12  ;;  %v2804_v44 = vmax.f32 %v2794_v6, 0.0 }
 0x3d1   : > { %v2805_v32 = vmax.f32 %v2796_v31, 0.0  ;;  %v2810_v7 = vmax.f32 %v2806_v37, %v2808_v35 }
 0x3d3   : > { %v2809_v1 = vmax.f32 %v2804_v44, %v2805_v32 }
 0x3d5   : > { %v2811_v36 = vmax.f32 %v2807_v48, %v2809_v1 }
 0x3d7   : > { %v2813_v54 = vpack.c.bf16 %v2811_v36, %v2810_v7 }
 0x3d9   : > { %3387 = vmatmul.mubr.bf16.vlgmr.msra.gmra.mxu1 %v2813_v54 }
 0x499   : > { %v2912_v34 = vpop.f32.mrf.mxu1 }
 0x49a   : > { %v2925_v15 = vadd.f32 %v3338_v19, %v2912_v34 }
 0x49b   : > { %v3388_v11 = vpop.f32.mrf.mxu1 }
 0x49d   : > { %v2915_v45 = vpop.f32.mrf.mxu1 }
 0x49e   : > { %v2926_v41 = vadd.f32 %v3338_v19, %v2915_v45 }
 0x49f   : > { %v3389_v60 = vpop.f32.mrf.mxu1 }
 0x4a0   : > { %v2927_v52 = vpack.c.bf16 %v2926_v41, %v2925_v15 }
 0x4a2   : > { %3407 = vmatmul.mubr.bf16.vlgmr.msra.gmra.mxu0 %v2927_v52 }
 0x562   : > { %v3033_v2 = vpop.f32.mrf.mxu0 }
 0x563   : > { %v3034_v40 = vadd.f32 %v3339_v46, %v3033_v2 }
 0x564   : > { %v3408_v55 = vpop.f32.mrf.mxu0 }
 0x565   : > { %3040 = vst [vmem:[%s386_s29] sm:$0xff] %v3034_v40 }
 0x566   : > { %v3036_v59 = vpop.f32.mrf.mxu0 }
 0x567   : > { %v3037_v53 = vadd.f32 %v3339_v46, %v3036_v59 }
 0x568   : > { %v3409_v47 = vpop.f32.mrf.mxu0 }
 0x569   : > { %3041 = vst [vmem:[%s386_s29 + $0x8] sm:$0xff] %v3037_v53 }
 0x56a PF: > { %s21_s17 = sadd.s32 1, %s3772_s17  }
 0x56b   : > { %p18_p4 = scmp.ge.s32.totalorder %s21_s17, 4  }
 0x56d   :  { %20 = sbr.rel (!%p18_p4) target bundleno = 1 (0x1), region = 94 }

</bundles_post_ra>
